<compile_context>
chip_gen: v7x
topology: tpu7x:2x2x1
jax: 0.10.0
libtpu: 0.0.40
codegen_flags: <defaults>
</compile_context>

<pallas_src>
import functools

import jax
import jax.numpy as jnp
from jax.experimental import pallas as pl
from jax.experimental.pallas import tpu as pltpu

INPUT_SIZE = 784
HIDDEN_SIZE = 128
NUM_CLASS = 10


def mlp_kernel(x_ref, w1_ref, b1_ref, w2_ref, b2_ref, o_ref):
    # In-kernel cast of the x tile to bf16 (VPU has huge slack; the f32 HBM read
    # of x happens exactly once).  No-op if the caller already passed bf16.
    x = x_ref[...].astype(jnp.bfloat16)
    # fc1: (tm, in)[bf16] @ (in, hidden)[bf16] -> f32 accumulate on the MXU.
    h = jnp.dot(x, w1_ref[...], preferred_element_type=jnp.float32)
    # bias-add + ReLU in f32 on the VPU (v5e has no bf16 VPU).
    h = jnp.maximum(h + b1_ref[...], 0.0)
    # fc2: cast hidden activations to bf16 for the MXU, accumulate in f32.
    out = jnp.dot(h.astype(w2_ref.dtype), w2_ref[...],
                  preferred_element_type=jnp.float32)
    o_ref[...] = (out + b2_ref[...]).astype(o_ref.dtype)


@functools.partial(jax.jit, static_argnames=("tm",))
def neural_net_forward(x, w1, b1, w2, b2, *, tm=2048):
    """x:(B, 784) f32/bf16, w1:(784,128), b1:(1,128), w2:(128,10), b2:(1,10)."""
    B = x.shape[0]

    # Weights in bf16 (tiny one-time cast, halves their HBM+VMEM footprint);
    # biases stay f32; x stays at its input dtype and is cast inside the kernel.
    w1 = w1.astype(jnp.bfloat16)
    w2 = w2.astype(jnp.bfloat16)
    b1 = b1.reshape(1, HIDDEN_SIZE).astype(jnp.float32)
    b2 = b2.reshape(1, NUM_CLASS).astype(jnp.float32)

    # --- Batch tile selection (all trace-time Python) ---
    tm = min(tm, B)
    if B >= 32:
        # Keep >= 2 batch tiles so v7x's second TensorCore gets work.
        tm = min(tm, pl.cdiv(B, 2))
    if tm >= 16:
        tm -= tm % 16          # sublane-pack friendly tile
    elif tm >= 8:
        tm = 8
    # else: tm == B < 8 -> a single block equal to the full (tiny) batch is legal
    num_tiles = pl.cdiv(B, tm)  # last tile may be ragged; Mosaic masks OOB DMA

    x_bytes = jnp.dtype(x.dtype).itemsize
    flops = 2 * B * (INPUT_SIZE * HIDDEN_SIZE + HIDDEN_SIZE * NUM_CLASS)
    bytes_accessed = (
        B * INPUT_SIZE * x_bytes               # x at its input dtype (read once)
        + INPUT_SIZE * HIDDEN_SIZE * 2         # w1 (bf16)
        + HIDDEN_SIZE * NUM_CLASS * 2          # w2 (bf16)
        + HIDDEN_SIZE * 4 + NUM_CLASS * 4      # biases (f32)
        + B * NUM_CLASS * 4                    # output (f32)
    )

    out = pl.pallas_call(
        mlp_kernel,
        out_shape=jax.ShapeDtypeStruct((B, NUM_CLASS), jnp.float32),
        grid=(num_tiles,),
        in_specs=[
            # x: one batch tile per grid step (ragged last tile allowed).
            pl.BlockSpec((tm, INPUT_SIZE), lambda i: (i, 0)),
            # Weights/biases: same block every step -> stay resident in VMEM.
            pl.BlockSpec((INPUT_SIZE, HIDDEN_SIZE), lambda i: (0, 0)),
            pl.BlockSpec((1, HIDDEN_SIZE), lambda i: (0, 0)),
            pl.BlockSpec((HIDDEN_SIZE, NUM_CLASS), lambda i: (0, 0)),
            pl.BlockSpec((1, NUM_CLASS), lambda i: (0, 0)),
        ],
        out_specs=pl.BlockSpec((tm, NUM_CLASS), lambda i: (i, 0)),
        compiler_params=pltpu.CompilerParams(
            dimension_semantics=("parallel",),   # batch tiles are independent
            vmem_limit_bytes=32 * 1024 * 1024,   # headroom for tm=2048 f32 x tiles
        ),
        cost_estimate=pl.CostEstimate(
            flops=flops, transcendentals=0, bytes_accessed=bytes_accessed),
    )(x, w1, b1, w2, b2)

    return out


def init_params(key):
    """Deterministic init mimicking nn.Linear's uniform(-1/sqrt(fan_in), 1/sqrt(fan_in))."""
    k1, k2, k3, k4 = jax.random.split(key, 4)
    bound1 = 1.0 / (INPUT_SIZE ** 0.5)
    bound2 = 1.0 / (HIDDEN_SIZE ** 0.5)
    w1 = jax.random.uniform(k1, (INPUT_SIZE, HIDDEN_SIZE), jnp.float32,
                            minval=-bound1, maxval=bound1)
    b1 = jax.random.uniform(k2, (1, HIDDEN_SIZE), jnp.float32,
                            minval=-bound1, maxval=bound1)
    w2 = jax.random.uniform(k3, (HIDDEN_SIZE, NUM_CLASS), jnp.float32,
                            minval=-bound2, maxval=bound2)
    b2 = jax.random.uniform(k4, (1, NUM_CLASS), jnp.float32,
                            minval=-bound2, maxval=bound2)
    return w1, b1, w2, b2


if __name__ == "__main__":
    key = jax.random.PRNGKey(0)
    kx, kp = jax.random.split(key)

    # B=300 with the default tile logic -> tm=144, 3 grid steps, ragged last
    # tile (rows 288..431 read OOB garbage that is masked on writeback).
    B = 300
    x = jax.random.normal(kx, (B, INPUT_SIZE), jnp.float32)
    w1, b1, w2, b2 = init_params(kp)

    out = neural_net_forward(x, w1, b1, w2, b2)
    out = jax.block_until_ready(out)
    assert out.shape == (B, NUM_CLASS)

    # Reference with the same bf16 operand rounding / f32 accumulation as the kernel.
    x_bf, w1_bf, w2_bf = (a.astype(jnp.bfloat16) for a in (x, w1, w2))
    ref_h = jnp.maximum(
        jnp.dot(x_bf, w1_bf, preferred_element_type=jnp.float32) + b1, 0.0)
    ref = jnp.dot(ref_h.astype(jnp.bfloat16), w2_bf,
                  preferred_element_type=jnp.float32) + b2
    assert jnp.allclose(out, ref, atol=1e-3, rtol=1e-3), \
        float(jnp.max(jnp.abs(out - ref)))

    # Loose sanity check against the full-f32 PyTorch-equivalent math.
    ref_f32 = jnp.maximum(x @ w1 + b1, 0.0) @ w2 + b2
    assert jnp.allclose(out, ref_f32, atol=5e-2, rtol=5e-2)

    print("KERNEL_OK")
</pallas_src>

<mosaic_0001>
module attributes {stable_mosaic.version = 11 : i64} {
  func.func @mlp_kernel(%arg0: i32, %arg1: memref<144x784xf32, #tpu.memory_space<vmem>>, %arg2: memref<784x128xbf16, #tpu.memory_space<vmem>>, %arg3: memref<1x128xf32, #tpu.memory_space<vmem>>, %arg4: memref<128x10xbf16, #tpu.memory_space<vmem>>, %arg5: memref<1x10xf32, #tpu.memory_space<vmem>>, %arg6: memref<144x10xf32, #tpu.memory_space<vmem>>) attributes {dimension_semantics = [#tpu.dimension_semantics<parallel>], iteration_bounds = array<i64: 3>, scalar_prefetch = 0 : i64, scratch_operands = 0 : i64, tpu.core_type = #tpu.core_type<tc>, window_params = [{transform_indices = @transform_0, window_bounds = array<i64: 144, 784>}, {pipeline_mode = #tpu.pipeline_mode<synchronous>, transform_indices = @transform_1, window_bounds = array<i64: 784, 128>}, {pipeline_mode = #tpu.pipeline_mode<synchronous>, transform_indices = @transform_2, window_bounds = array<i64: 1, 128>}, {pipeline_mode = #tpu.pipeline_mode<synchronous>, transform_indices = @transform_3, window_bounds = array<i64: 128, 10>}, {pipeline_mode = #tpu.pipeline_mode<synchronous>, transform_indices = @transform_4, window_bounds = array<i64: 1, 10>}, {transform_indices = @transform_5, window_bounds = array<i64: 144, 10>}]} {
    %c0 = arith.constant 0 : index
    %c0_0 = arith.constant 0 : index
    %0 = vector.load %arg1[%c0, %c0_0] : memref<144x784xf32, #tpu.memory_space<vmem>>, vector<144x784xf32>
    %1 = arith.truncf %0 : vector<144x784xf32> to vector<144x784xbf16>
    %c0_1 = arith.constant 0 : index
    %c0_2 = arith.constant 0 : index
    %2 = vector.load %arg2[%c0_1, %c0_2] : memref<784x128xbf16, #tpu.memory_space<vmem>>, vector<784x128xbf16>
    %cst = arith.constant dense<0.000000e+00> : vector<144x128xf32>
    %3 = tpu.matmul %1, %2, %cst {dimension_numbers = #tpu.dot_dimension_numbers<[1], [0], [0], [1], [0, 0, 1, 1], [], []>} : vector<144x784xbf16>, vector<784x128xbf16>, vector<144x128xf32> -> vector<144x128xf32>
    %c0_3 = arith.constant 0 : index
    %c0_4 = arith.constant 0 : index
    %4 = vector.load %arg3[%c0_3, %c0_4] : memref<1x128xf32, #tpu.memory_space<vmem>>, vector<1x128xf32>
    %5 = vector.broadcast %4 : vector<1x128xf32> to vector<144x128xf32>
    %6 = arith.addf %3, %5 : vector<144x128xf32>
    %cst_5 = arith.constant 0.000000e+00 : f32
    %7 = vector.broadcast %cst_5 : f32 to vector<144x128xf32>
    %8 = arith.maximumf %6, %7 : vector<144x128xf32>
    %9 = arith.truncf %8 : vector<144x128xf32> to vector<144x128xbf16>
    %c0_6 = arith.constant 0 : index
    %c0_7 = arith.constant 0 : index
    %10 = vector.load %arg4[%c0_6, %c0_7] : memref<128x10xbf16, #tpu.memory_space<vmem>>, vector<128x10xbf16>
    %cst_8 = arith.constant dense<0.000000e+00> : vector<144x10xf32>
    %11 = tpu.matmul %9, %10, %cst_8 {dimension_numbers = #tpu.dot_dimension_numbers<[1], [0], [0], [1], [0, 0, 1, 1], [], []>} : vector<144x128xbf16>, vector<128x10xbf16>, vector<144x10xf32> -> vector<144x10xf32>
    %c0_9 = arith.constant 0 : index
    %c0_10 = arith.constant 0 : index
    %12 = vector.load %arg5[%c0_9, %c0_10] : memref<1x10xf32, #tpu.memory_space<vmem>>, vector<1x10xf32>
    %13 = vector.broadcast %12 : vector<1x10xf32> to vector<144x10xf32>
    %14 = arith.addf %11, %13 : vector<144x10xf32>
    %c0_11 = arith.constant 0 : index
    %c0_12 = arith.constant 0 : index
    %15 = vector.load %arg6[%c0_11, %c0_12] : memref<144x10xf32, #tpu.memory_space<vmem>>, vector<144x10xf32>
    tpu.vector_store %arg6[%c0_11, %c0_12], %14 {strides = array<i32>} : memref<144x10xf32, #tpu.memory_space<vmem>>, vector<144x10xf32>,
    return
  }
  func.func @transform_0(%arg0: i32) -> (i32, i32) {
    %c0_i32 = arith.constant 0 : i32
    %c0_i32_0 = arith.constant 0 : i32
    return %arg0, %c0_i32 : i32, i32
  }
  func.func @transform_1(%arg0: i32) -> (i32, i32) {
    %c0_i32 = arith.constant 0 : i32
    %c0_i32_0 = arith.constant 0 : i32
    %c0_i32_1 = arith.constant 0 : i32
    return %c0_i32, %c0_i32_0 : i32, i32
  }
  func.func @transform_2(%arg0: i32) -> (i32, i32) {
    %c0_i32 = arith.constant 0 : i32
    %c0_i32_0 = arith.constant 0 : i32
    %c0_i32_1 = arith.constant 0 : i32
    return %c0_i32, %c0_i32_0 : i32, i32
  }
  func.func @transform_3(%arg0: i32) -> (i32, i32) {
    %c0_i32 = arith.constant 0 : i32
    %c0_i32_0 = arith.constant 0 : i32
    %c0_i32_1 = arith.constant 0 : i32
    return %c0_i32, %c0_i32_0 : i32, i32
  }
  func.func @transform_4(%arg0: i32) -> (i32, i32) {
    %c0_i32 = arith.constant 0 : i32
    %c0_i32_0 = arith.constant 0 : i32
    %c0_i32_1 = arith.constant 0 : i32
    return %c0_i32, %c0_i32_0 : i32, i32
  }
  func.func @transform_5(%arg0: i32) -> (i32, i32) {
    %c0_i32 = arith.constant 0 : i32
    %c0_i32_0 = arith.constant 0 : i32
    return %arg0, %c0_i32 : i32, i32
  }
}

</mosaic_0001>

<bundles_post_ra>
// kernel: neural_net_forward.1
= control target key start
LH: loop header
LB: loop body
LE: loop exit
PB: predicated region body
PF: predicated region fallthrough
CT: control target
= control target key end

     0   :  { %10 = vsyncpa [#allocation3], 0  ;;  %s3512_s0 = inlined_call_operand.hbm [shape: f32[300,784], index: 0, kind: input, shape index: {}]   ;;  %s3513_s1 = inlined_call_operand.vmem [shape: bf16[784,128], index: 1, kind: input, shape index: {}]   ;;  %s3514_s2 = inlined_call_operand.hbm [shape: f32[1,128], index: 2, kind: input, shape index: {}]   ;;  %s3515_s3 = inlined_call_operand.vmem [shape: bf16[128,10], index: 3, kind: input, shape index: {}]   ;;  %s3516_s4 = inlined_call_operand.hbm [shape: f32[1,10], index: 4, kind: input, shape index: {}]   ;;  %s3517_s5 = inlined_call_operand.vmem [shape: f32[300,10], index: 5, kind: output, shape index: {}]  }
   0x1   :  { %12 = vsyncpa [#allocation3 + $0x1], 0 }
   0x2   :  { %13 = vsyncpa [#allocation5], 0  ;;  %s2708_s18 = smov 0   ;;  %s2710_s19 = smov 0  }
   0x3   :  { %s2712_s20 = smov 0   ;;  %s2714_s21 = smov 0  }
   0x4 LB: > { %s2727_s22 = sadd.s32 4294967295, %s2637_s21   ;;  %s2730_s23 = sadd.s32 1, %s2637_s21   ;;  %s2637_s21 = sphi %s2714_s21, %s3538_s21   ;;  %s2633_s20 = sphi %s2712_s20, %s3537_s20   ;;  %s2629_s19 = sphi %s2710_s19, %s3536_s19   ;;  %s2625_s18 = sphi %s2708_s18, %s3535_s18  }
   0x5   : > { %s23_s24 = ssub.s32 %s2637_s21, %s2730_s23  ;;  %s26_s25 = sadd.s32 1, %s2633_s20 }
   0x6   : > { %p24_p0 = scmp.eq.s32.totalorder %s23_s24, 0  ;;  %p33_p1 = scmp.ne.s32.totalorder %s2633_s20, %s2629_s19 }
   0x7   : > { %p34_p2 = scmp.eq.s32.totalorder %s2637_s21, 0  ;;  %p39_p3 = scmp.ne.s32.totalorder %s2629_s19, %s2625_s18 }
   0x8   : > { %s2740_s26 = scalar_select %p24_p0, %s2633_s20, %s26_s25  }
   0x9   : > { %p2742_p4 = por %p34_p2, %p33_p1  ;;  %p3518_p5 = scmp.eq.s32.totalorder %s2727_s22, 0 }
   0xa   : > { %p147_p6 = scmp.eq.s32.totalorder %s2727_s22, 2  ;;  %p1858_p7 = scmp.ge.s32.totalorder %s2637_s21, 1 }
   0xb   : > { %s3521_s27 = scalar_select %p2742_p4, 1, 0 }
   0xc   : > { %p2751_p8 = por %p3518_p5, %p39_p3  ;;  %p160_p9 = scmp.lt.s32.totalorder %s2637_s21, 4 }
   0xd   : > { %p2756_p10 = por %p147_p6, %p33_p1  ;;  %s2671_s6 = smov [#allocation4]  }
   0xe   : > { %s3522_s28 = scalar_select %p2751_p8, 1, 0 }
   0xf   : > { %s3523_s29 = scalar_select %p2756_p10, 1, 0 }
  0x10   : > { %p2760_p11 = pnand %p1858_p7, %p160_p9  ;;  %s176_s7 = sshll.u32 %s2671_s6, 4  ;;  %s177_s7 = int_to_ptr.vmem [resolvable:$true] %s176_s7 }
  0x11   : > { %s2672_s8 = smov [#allocation6]   ;;  %s2483_s13 = scalar_lea.hbm %s3514_s2, 16 }
  0x12   : > { %s3524_s30 = scalar_select %p2760_p11, 1, 0 }
  0x13   : > { %p2307_p12 = pneg %p2760_p11  ;;  %s190_s9 = sshll.u32 %s2672_s8, 4  ;;  %s2772_s9 = int_to_ptr.vmem [resolvable:$true] %s190_s9 }
  0x14   : > { %p2484_p0 = scmp.ne.s32.totalorder %s3514_s2, %s2483_s13  ;;  %p2490_p6 = scmp.lt.u32.totalorder %s2483_s13, %s3514_s2 }
  0x15   : > { %p2768_p13 = pnand %p2307_p12, %p3518_p5 }
  0x17   : > { %p2485_p1 = pneg %p2768_p13 }
  0x19   : > { %p2486_p2 = pnand %p2485_p1, %p2484_p0 }
  0x1b   : > { %p2487_p3 = pneg %p2486_p2 }
  0x1d   : > { %p2492_p7 = pnand %p2490_p6, %p2487_p3 }
  0x1f   : > { %2495 = shalt.err (!%p2492_p7)
}
  0x20   : > { %s2496_s18 = scalar_lea.vmem %s177_s7, 16  ;;  %s2503_s24 = scalar_lea.vmem %s177_s7, 32 }
  0x21   : > { %p2497_p9 = scmp.ne.s32.totalorder %s177_s7, %s2496_s18  ;;  %p2504_p10 = scmp.lt.s32.totalorder %s177_s7, %s177_s7 }
  0x22   : > { %p2505_p8 = scmp.lt.s32.totalorder %s2503_s24, %s2496_s18 }
  0x23   : > { %p2499_p12 = pnand %p2497_p9, %p2485_p1 }
  0x24   : > { %p2506_p11 = por %p2505_p8, %p2504_p10 }
  0x25   : > { %p2500_p5 = pneg %p2499_p12 }
  0x27   : > { %p2507_p4 = pnand %p2506_p11, %p2500_p5 }
  0x29   : > { %2510 = shalt.err (!%p2507_p4)
}
  0x2a   : > { %2310 = dma.hbm_to_vmem [thread:$0]  (!%p2768_p13), %s3514_s2, 16, %s177_s7, [#allocation5]  }
  0x2b   : > { %s2511_s12 = scalar_lea.hbm %s3516_s4, 16 }
  0x2c   : > { %p2512_p0 = scmp.ne.s32.totalorder %s3516_s4, %s2511_s12  ;;  %p2518_p4 = scmp.lt.u32.totalorder %s2511_s12, %s3516_s4 }
  0x2e   : > { %p2514_p8 = pnand %p2512_p0, %p2485_p1 }
  0x30   : > { %p2515_p5 = pneg %p2514_p8 }
  0x32   : > { %p2520_p10 = pnand %p2518_p4, %p2515_p5 }
  0x34   : > { %2523 = shalt.err (!%p2520_p10)
}
  0x35   : > { %s2524_s7 = scalar_lea.vmem %s2772_s9, 16  ;;  %s2531_s17 = scalar_lea.vmem %s2772_s9, 32 }
  0x36   : > { %p2525_p11 = scmp.ne.s32.totalorder %s2772_s9, %s2524_s7  ;;  %p2532_p6 = scmp.lt.s32.totalorder %s2772_s9, %s2772_s9 }
  0x37   : > { %p2533_p7 = scmp.lt.s32.totalorder %s2531_s17, %s2524_s7 }
  0x38   : > { %p2527_p2 = pnand %p2525_p11, %p2485_p1 }
  0x39   : > { %p2534_p9 = por %p2533_p7, %p2532_p6 }
  0x3a   : > { %p2528_p3 = pneg %p2527_p2 }
  0x3c   : > { %p2535_p12 = pnand %p2534_p9, %p2528_p3 }
  0x3e   : > { %2538 = shalt.err (!%p2535_p12)
}
  0x3f   : > { %2313 = dma.hbm_to_vmem [thread:$0]  (!%p2768_p13), %s3516_s4, 16, %s2772_s9, [#allocation5]  }
  0x40   : > { %p1861_p0 = scmp.ge.s32.totalorder %s2637_s21, 3 }
  0x41   : > { %p3526_p1 = scmp.ne.s32.totalorder (!%p1861_p0), %s3521_s27, 0 }
  0x42   : > { %197 = sbr.rel (%p1861_p0) target bundleno = 109 (0x6d), region = 32 }
  0x49   : > { %200 = sbr.rel (!%p3526_p1) target bundleno = 109 (0x6d), region = 36  ;;  %s201_s25 = sand.u32 (%p3526_p1), 1, %s2633_s20  }
  0x4a   : > { %s206_s6 = smul.u32 (%p3526_p1), 18, %s2637_s21  ;;  %s2830_s13 = scalar_lea.sflag (%p3526_p1), [#allocation3], %s201_s25 }
  0x4b   : > { %s2294_s8 = smul.u32 (%p3526_p1), 1008, %s201_s25 }
  0x4c   : > { %s207_s11 = ssub.s32 (%p3526_p1), 38, %s206_s6 }
  0x4d   : > { %p208_p8 = scmp.lt.s32.totalorder (%p3526_p1), %s207_s11, 18  ;;  %s205_s9 = scalar_lea.vmem (%p3526_p1), [#allocation2], %s2294_s8 }
  0x50   : > { %s3540_s11 = smov (!%p208_p8, %s207_s11), 18 }
  0x51   : > { %s2827_s10 = smul.u32 896, %s3540_s11 }
  0x53   : > { %s213_s12 = ssub.s32 16128, %s2827_s10 }
  0x54   : > { %214 = vsyncadd %s2830_s13, %s213_s12  ;;  %p1864_p13 = scmp.ne.s32.totalorder %s2827_s10, 0  ;;  %s2316_s27 = smul.u32 16128, %s2637_s21 }
  0x55   : > { %s220_s14 = sshll.u32 %s205_s9, 4  ;;  %s2543_s21 = scalar_lea.hbm %s3512_s0, 34048  ;;  %s2840_s14 = int_to_ptr.vmem [resolvable:$true] %s220_s14 }
  0x56   : > { %s2838_s7 = scalar_lea.hbm %s3512_s0, %s2316_s27 }
  0x57   : > { %s2539_s17 = scalar_lea.hbm %s2838_s7, %s2827_s10  ;;  %p2544_p11 = scmp.lt.u32.totalorder %s2838_s7, %s3512_s0 }
  0x58   : > { %p2540_p5 = scmp.ne.s32.totalorder %s2838_s7, %s2539_s17  ;;  %p2545_p2 = scmp.lt.u32.totalorder %s2543_s21, %s2539_s17 }
  0x59   : > { %p2547_p6 = scmp.lt.u32.totalorder %s2539_s17, %s2838_s7 }
  0x5a   : > { %p2541_p4 = pnand %p2540_p5, %p1864_p13  ;;  %p2546_p3 = por %p2545_p2, %p2544_p11 }
  0x5c   : > { %p2542_p10 = pneg %p2541_p4  ;;  %p2548_p7 = por %p2547_p6, %p2546_p3 }
  0x5e   : > { %p2549_p9 = pnand %p2548_p7, %p2542_p10 }
  0x60   : > { %2552 = shalt.err (!%p2549_p9)
}
  0x61   : > { %s2553_s8 = scalar_lea.vmem %s2840_s14, %s2827_s10  ;;  %s2673_s11 = smov [#allocation2]  }
  0x62   : > { %p2554_p12 = scmp.ne.s32.totalorder %s2840_s14, %s2553_s8  ;;  %s2557_s12 = sshll.u32 %s2673_s11, 4  ;;  %s2558_s12 = int_to_ptr.vmem [resolvable:$false] %s2557_s12 }
  0x63   : > { %s2559_s9 = scalar_lea.vmem %s2558_s12, 32256  ;;  %p2560_p8 = scmp.lt.s32.totalorder %s2840_s14, %s2558_s12 }
  0x64   : > { %p2555_p0 = pnand %p2554_p12, %p1864_p13  ;;  %p2561_p5 = scmp.lt.s32.totalorder %s2559_s9, %s2553_s8 }
  0x66   : > { %p2556_p1 = pneg %p2555_p0  ;;  %p2562_p4 = por %p2561_p5, %p2560_p8 }
  0x68   : > { %p2563_p11 = pnand %p2562_p4, %p2556_p1 }
  0x6a   : > { %2566 = shalt.err (!%p2563_p11)
}
  0x6b   : > { %s2674_s27 = smov 896   ;;  %s2675_s15 = smov 56  }
  0x6c   : > { %226 = dma.hbm_to_vmem [thread:$0]  (%p1864_p13), %s2838_s7, %s2827_s10, %s2840_s14, %s2830_s13, %s2674_s27, %s2674_s27, %s2675_s15  }
  0x6d PF: > { %p3527_p10 = scmp.ne.s32.totalorder %s3524_s30, 0 }
  0x6e   : > { %s2870_s16 = sand.u32 (!%p3527_p10), 1, %s2629_s19   ;;  %p3528_p2 = scmp.ne.s32.totalorder (!%p3527_p10), %s3522_s28, 0 }
  0x6f   : > { %232 = sbr.rel (%p3527_p10) target bundleno = 829 (0x33d), region = 40  ;;  %s235_s18 = scalar_lea.sflag (!%p3527_p10), [#allocation3], %s2870_s16 }
  0x70   : > { %s2296_s17 = smul.u32 (!%p3527_p10), 1008, %s2870_s16 }
  0x72   : > { %s2874_s24 = scalar_lea.vmem (!%p3527_p10), [#allocation2], %s2296_s17 }
  0x76   : > { %2616 = dma.done.wait (%p3528_p2), %s235_s18, 16128  }
  0x77   : > { %2618 = vsyncadd (%p3528_p2), %s235_s18, 4294951168  ;;  %p3529_p13 = scmp.eq.s32.totalorder %s2727_s22, 0 }
  0x79   : > { %2620 = dma.done.wait (%p3529_p13), [#allocation5], 32   ;;  %p3530_p3 = pmov %p3529_p13 }
  0x7a   : > { %v2422_v0 = vld [vmem:[%s3513_s1 + $0x40] sm:$0xff]   ;;  %v2424_v2 = vld [vmem:[%s3513_s1 + $0x48] sm:$0xff]   ;;  %v2426_v4 = vld [vmem:[%s3513_s1 + $0x50] sm:$0xff]   ;;  %vm2677_vm0 = vmmov 0   ;;  %vm872_vm1 = vcmask 130048   ;;  %s2297_s12 = smul.u32 144, %s2870_s16 }
  0x7b   : > { %2622 = vsyncadd (%p3530_p3), [#allocation5], 4294967264  ;;  %v2423_v1 = vld [vmem:[%s3513_s1] sm:$0xff]   ;;  %2278 = vmatprep.subr.bf16.mxu1 %v2422_v0  ;;  %1951 = vmatprep.subr.bf16.mxu0 %v2422_v0  ;;  %v2425_v3 = vld [vmem:[%s3513_s1 + $0x8] sm:$0xff]   ;;  %vm1523_vm2 = vcmask 80896   ;;  %p3531_p6 = scmp.ne.s32.totalorder %s3523_s29, 0 }
  0x7c   : > { %2286 = vmatpush3.bf16.msra.mxu1 %v2423_v1  ;;  %1952 = vmatpush3.bf16.msra.mxu0 %v2423_v1  ;;  %v2427_v5 = vld [vmem:[%s3513_s1 + $0x10] sm:$0xff]   ;;  %v2428_v6 = vld [vmem:[%s3513_s1 + $0x58] sm:$0xff]   ;;  %v2430_v8 = vld [vmem:[%s3513_s1 + $0x60] sm:$0xff]   ;;  %s3355_s9 = scalar_lea.vmem [#allocation7], %s2297_s12   ;;  %s1549_s16 = smul.u32 (%p3531_p6), 18, %s2727_s22 }
  0x7d   : > { %2279 = vmatprep.subr.bf16.mxu1 %v2424_v2  ;;  %1953 = vmatprep.subr.bf16.mxu0 %v2424_v2  ;;  %v2429_v7 = vld [vmem:[%s3513_s1 + $0x18] sm:$0xff]   ;;  %v2431_v9 = vld [vmem:[%s3513_s1 + $0x20] sm:$0xff]   ;;  %v2432_v10 = vld [vmem:[%s3513_s1 + $0x68] sm:$0xff]   ;;  %s1950_s27 = smul.u32 (%p3531_p6), 144, %s2727_s22 }
  0x7e   : > { %v341_v11 = vld [vmem:[%s2874_s24 + $0x1c8] sm:$0xff]  ;;  %v348_v12 = vld [vmem:[%s2874_s24 + $0x200] sm:$0xff]  ;;  %v347_v23 = vld [vmem:[%s2874_s24 + $0x1f8] sm:$0xff]  ;;  %s1550_s15 = ssub.s32 (%p3531_p6), 38, %s1549_s16 }
  0x7f   : > { %v439_v13 = vpack.c.bf16 %v348_v12, %v341_v11  ;;  %v2433_v14 = vld [vmem:[%s3513_s1 + $0x28] sm:$0xff]   ;;  %v2434_v15 = vld [vmem:[%s3513_s1 + $0x70] sm:$0xff]   ;;  %v2436_v19 = vld [vmem:[%s3513_s1 + $0x78] sm:$0xff]   ;;  %p1551_p7 = scmp.lt.s32.totalorder (%p3531_p6), %s1550_s15, 18  ;;  %s3417_s30 = scalar_lea.vmem (%p3531_p6), %s3517_s5, %s1950_s27  }
  0x80   : > { %2287 = vmatpush3.bf16.msra.mxu1 %v2425_v3  ;;  %1954 = vmatpush3.bf16.msra.mxu0 %v2425_v3  ;;  %v285_v16 = vld [vmem:[%s2874_s24 + $0x8] sm:$0xff]  ;;  %v2435_v17 = vld [vmem:[%s3513_s1 + $0x30] sm:$0xff]   ;;  %v2438_v24 = vld [vmem:[%s3513_s1 + $0xc0] sm:$0xff]  }
  0x81   : > { %2280 = vmatprep.subr.bf16.mxu1 %v2426_v4  ;;  %1955 = vmatprep.subr.bf16.mxu0 %v2426_v4  ;;  %v292_v18 = vld [vmem:[%s2874_s24 + $0x40] sm:$0xff]  ;;  %v2437_v21 = vld [vmem:[%s3513_s1 + $0x38] sm:$0xff]   ;;  %v362_v26 = vld [vmem:[%s2874_s24 + $0x270] sm:$0xff] }
  0x82   : > { %964 = vmatprep.mubr.bf16.mxu1 %v439_v13  ;;  %v411_v20 = vpack.c.bf16 %v292_v18, %v285_v16  ;;  %v340_v22 = vld [vmem:[%s2874_s24 + $0x1c0] sm:$0xff]  ;;  %v355_v25 = vld [vmem:[%s2874_s24 + $0x238] sm:$0xff]  ;;  %v354_v37 = vld [vmem:[%s2874_s24 + $0x230] sm:$0xff] }
  0x83   : > { %v284_v27 = vld [vmem:[%s2874_s24] sm:$0xff]  ;;  %v291_v28 = vld [vmem:[%s2874_s24 + $0x38] sm:$0xff]  ;;  %v438_v30 = vpack.c.bf16 %v347_v23, %v340_v22  ;;  %v446_v34 = vpack.c.bf16 %v362_v26, %v355_v25  ;;  %v361_v38 = vld [vmem:[%s2874_s24 + $0x268] sm:$0xff] }
  0x84   : > { %2288 = vmatpush3.bf16.msra.mxu1 %v2427_v5  ;;  %1956 = vmatpush3.bf16.msra.mxu0 %v2427_v5  ;;  %v2443_v29 = vld [vmem:[%s3513_s1 + $0x140] sm:$0xff]   ;;  %v410_v31 = vpack.c.bf16 %v291_v28, %v284_v27  ;;  %v2440_v33 = vld [vmem:[%s3513_s1 + $0xc8] sm:$0xff]   ;;  %v2442_v42 = vld [vmem:[%s3513_s1 + $0xd0] sm:$0xff]   ;;  %v445_v50 = vpack.c.bf16 %v361_v38, %v354_v37 }
  0x85   : > { %2281 = vmatprep.subr.bf16.mxu1 %v2428_v6  ;;  %1957 = vmatprep.subr.bf16.mxu0 %v2428_v6  ;;  %v2439_v32 = vld [vmem:[%s3513_s1 + $0x80] sm:$0xff]   ;;  %v2441_v36 = vld [vmem:[%s3513_s1 + $0x88] sm:$0xff]   ;;  %v2450_v49 = vld [vmem:[%s3513_s1 + $0x150] sm:$0xff]  }
  0x86   : > { %932 = vmatprep.mubr.bf16.mxu0 %v411_v20  ;;  %v2445_v35 = vld [vmem:[%s3513_s1 + $0x100] sm:$0xff]   ;;  %v2446_v39 = vld [vmem:[%s3513_s1 + $0x148] sm:$0xff]   ;;  %v2444_v52 = vld [vmem:[%s3513_s1 + $0x90] sm:$0xff]  }
  0x87   : > { %v299_v40 = vld [vmem:[%s2874_s24 + $0x78] sm:$0xff]  ;;  %v306_v41 = vld [vmem:[%s2874_s24 + $0xb0] sm:$0xff]  ;;  %v369_v43 = vld [vmem:[%s2874_s24 + $0x2a8] sm:$0xff] }
  0x88   : > { %2289 = vmatpush3.bf16.msra.mxu1 %v2429_v7  ;;  %1958 = vmatpush3.bf16.msra.mxu0 %v2429_v7  ;;  %v376_v44 = vld [vmem:[%s2874_s24 + $0x2e0] sm:$0xff]  ;;  %v418_v45 = vpack.c.bf16 %v306_v41, %v299_v40  ;;  %v298_v46 = vld [vmem:[%s2874_s24 + $0x70] sm:$0xff]  ;;  %v305_v47 = vld [vmem:[%s2874_s24 + $0xa8] sm:$0xff] }
  0x89   : > { %2282 = vmatprep.subr.bf16.mxu1 %v2430_v8  ;;  %1959 = vmatprep.subr.bf16.mxu0 %v2430_v8  ;;  %v2448_v48 = vld [vmem:[%s3513_s1 + $0x108] sm:$0xff]   ;;  %v417_v51 = vpack.c.bf16 %v305_v47, %v298_v46  ;;  %v453_v53 = vpack.c.bf16 %v376_v44, %v369_v43  ;;  %v2447_v54 = vld [vmem:[%s3513_s1 + $0xd8] sm:$0xff]   ;;  %v2451_v55 = vld [vmem:[%s3513_s1 + $0x110] sm:$0xff]   ;;  %v2676_v46 = vmov 0.0  }
  0x8a   : > { %v368_v56 = vld [vmem:[%s2874_s24 + $0x2a0] sm:$0xff]  ;;  %v375_v57 = vld [vmem:[%s2874_s24 + $0x2d8] sm:$0xff]  ;;  %v390_v62 = vld [vmem:[%s2874_s24 + $0x350] sm:$0xff] }
  0x8b   : > { %v2449_v58 = vld [vmem:[%s3513_s1 + $0x98] sm:$0xff]   ;;  %v2452_v60 = vld [vmem:[%s3513_s1 + $0xe0] sm:$0xff]   ;;  %v452_v6 = vpack.c.bf16 %v375_v57, %v368_v56  ;;  %v2460_v16 = vld [vmem:[%s3513_s1 + $0xf0] sm:$0xff]  }
  0x8c   : > { %2290 = vmatpush3.bf16.msra.mxu1 %v2431_v9  ;;  %1960 = vmatpush3.bf16.msra.mxu0 %v2431_v9  ;;  %v2454_v59 = vld [vmem:[%s3513_s1 + $0x158] sm:$0xff]   ;;  %v320_v0 = vld [vmem:[%s2874_s24 + $0x120] sm:$0xff]  ;;  %v382_v12 = vld [vmem:[%s2874_s24 + $0x310] sm:$0xff] }
  0x8d   : > { %2283 = vmatprep.subr.bf16.mxu1 %v2432_v10  ;;  %1961 = vmatprep.subr.bf16.mxu0 %v2432_v10  ;;  %v383_v61 = vld [vmem:[%s2874_s24 + $0x318] sm:$0xff]  ;;  %v313_v63 = vld [vmem:[%s2874_s24 + $0xe8] sm:$0xff]  ;;  %v312_v3 = vld [vmem:[%s2874_s24 + $0xe0] sm:$0xff] }
  0x8e   : > { %v2455_v1 = vld [vmem:[%s3513_s1 + $0x118] sm:$0xff]   ;;  %v425_v2 = vpack.c.bf16 %v320_v0, %v313_v63  ;;  %v2453_v5 = vld [vmem:[%s3513_s1 + $0xa0] sm:$0xff]   ;;  %v460_v9 = vpack.c.bf16 %v390_v62, %v383_v61  ;;  %v2456_v10 = vld [vmem:[%s3513_s1 + $0xe8] sm:$0xff]  }
  0x8f   : > { %v319_v4 = vld [vmem:[%s2874_s24 + $0x118] sm:$0xff]  ;;  %v2458_v8 = vld [vmem:[%s3513_s1 + $0x160] sm:$0xff]   ;;  %v389_v13 = vld [vmem:[%s2874_s24 + $0x348] sm:$0xff] }
  0x90   : > { %2291 = vmatpush3.bf16.msra.mxu1 %v2433_v14  ;;  %1962 = vmatpush3.bf16.msra.mxu0 %v2433_v14  ;;  %v424_v7 = vpack.c.bf16 %v319_v4, %v312_v3  ;;  %v2459_v11 = vld [vmem:[%s3513_s1 + $0x120] sm:$0xff]   ;;  %v2457_v14 = vld [vmem:[%s3513_s1 + $0xa8] sm:$0xff]   ;;  %v459_v25 = vpack.c.bf16 %v389_v13, %v382_v12  ;;  %v2464_v28 = vld [vmem:[%s3513_s1 + $0x170] sm:$0xff]  }
  0x91   : > { %2284 = vmatprep.subr.bf16.mxu1 %v2434_v15  ;;  %1963 = vmatprep.subr.bf16.mxu0 %v2434_v15  ;;  %v2461_v15 = vld [vmem:[%s3513_s1 + $0x168] sm:$0xff]   ;;  %v404_v18 = vld [vmem:[%s2874_s24 + $0x3c0] sm:$0xff]  ;;  %v334_v22 = vld [vmem:[%s2874_s24 + $0x190] sm:$0xff] }
  0x92   : > { %v327_v20 = vld [vmem:[%s2874_s24 + $0x158] sm:$0xff]  ;;  %v326_v23 = vld [vmem:[%s2874_s24 + $0x150] sm:$0xff]  ;;  %v296_v40 = vld [vmem:[%s2874_s24 + $0x60] sm:$0xff] }
  0x93   : > { %v432_v26 = vpack.c.bf16 %v334_v22, %v327_v20  ;;  %v294_v37 = vld [vmem:[%s2874_s24 + $0x50] sm:$0xff]  ;;  %v2469_v38 = vld [vmem:[%s3513_s1 + $0x138] sm:$0xff]   ;;  %v288_v44 = vld [vmem:[%s2874_s24 + $0x20] sm:$0xff] }
  0x94   : > { %2292 = vmatpush3.bf16.msra.mxu1 %v2435_v17  ;;  %1964 = vmatpush3.bf16.msra.mxu0 %v2435_v17  ;;  %v397_v17 = vld [vmem:[%s2874_s24 + $0x388] sm:$0xff]  ;;  %v300_v0 = vld [vmem:[%s2874_s24 + $0x80] sm:$0xff]  ;;  %v322_v3 = vld [vmem:[%s2874_s24 + $0x130] sm:$0xff] }
  0x95   : > { %2285 = vmatprep.subr.bf16.mxu1 %v2436_v19  ;;  %1965 = vmatprep.subr.bf16.mxu0 %v2436_v19  ;;  %v2463_v19 = vld [vmem:[%s3513_s1 + $0x128] sm:$0xff]   ;;  %v316_v4 = vld [vmem:[%s2874_s24 + $0x100] sm:$0xff]  ;;  %v314_v12 = vld [vmem:[%s2874_s24 + $0xf0] sm:$0xff] }
  0x96   : > { %v309_v56 = vld [vmem:[%s2874_s24 + $0xc8] sm:$0xff]  ;;  %v352_v20 = vld [vmem:[%s2874_s24 + $0x220] sm:$0xff] }
  0x97   : > { %v321_v13 = vld [vmem:[%s2874_s24 + $0x128] sm:$0xff] }
  0x98   : > { %2293 = vmatpush3.bf16.msra.mxu1 %v2437_v21  ;;  %1966 = vmatpush3.bf16.msra.mxu0 %v2437_v21  ;;  %v2462_v21 = vld [vmem:[%s3513_s1 + $0xb0] sm:$0xff]  }
  0x99   : > { %2021 = vmatprep.subr.bf16.mxu1 %v2438_v24  ;;  %2091 = vmatprep.subr.bf16.mxu0 %v2443_v29  ;;  %v333_v24 = vld [vmem:[%s2874_s24 + $0x188] sm:$0xff]  ;;  %v467_v29 = vpack.c.bf16 %v404_v18, %v397_v17  ;;  %v426_v18 = vpack.c.bf16 %v321_v13, %v314_v12  ;;  %v406_v12 = vld [vmem:[%s2874_s24 + $0x3d0] sm:$0xff]  ;;  %v400_v13 = vld [vmem:[%s2874_s24 + $0x3a0] sm:$0xff] }
  0x9a   : > { %v431_v27 = vpack.c.bf16 %v333_v24, %v326_v23  ;;  %v337_v17 = vld [vmem:[%s2874_s24 + $0x1a8] sm:$0xff]  ;;  %v328_v23 = vld [vmem:[%s2874_s24 + $0x160] sm:$0xff] }
  0x9b   : > { %965 = vmatmul.mubr.bf16.vlgmr.msra.gmra.mrb[0].mxu1 %v438_v30  ;;  %933 = vmatmul.mubr.bf16.vlgmr.msra.gmra.mrb[0].mxu0 %v410_v31  ;;  %v2465_v30 = vld [vmem:[%s3513_s1 + $0xf8] sm:$0xff]   ;;  %v2466_v31 = vld [vmem:[%s3513_s1 + $0x130] sm:$0xff]  }
  0x9c   : > { %2022 = vmatpush3.bf16.msra.mxu1 %v2439_v32  ;;  %972 = vmatprep.mubr.bf16.mxu1 %v446_v34  ;;  %v396_v32 = vld [vmem:[%s2874_s24 + $0x380] sm:$0xff]  ;;  %v2468_v34 = vld [vmem:[%s3513_s1 + $0x178] sm:$0xff]  }
  0x9d   : > { %2023 = vmatprep.subr.bf16.mxu1 %v2440_v33  ;;  %2092 = vmatpush3.bf16.msra.mxu0 %v2445_v35  ;;  %v403_v33 = vld [vmem:[%s2874_s24 + $0x3b8] sm:$0xff] }
  0x9e   : > { %2093 = vmatprep.subr.bf16.mxu0 %v2446_v39  ;;  %940 = vmatprep.mubr.bf16.mxu0 %v418_v45  ;;  %v2467_v35 = vld [vmem:[%s3513_s1 + $0xb8] sm:$0xff]   ;;  %v466_v41 = vpack.c.bf16 %v403_v33, %v396_v32 }
  0x9f   : > { %v289_v39 = vld [vmem:[%s2874_s24 + $0x28] sm:$0xff]  ;;  %v295_v45 = vld [vmem:[%s2874_s24 + $0x58] sm:$0xff] }
  0xa0   : > { %2024 = vmatpush3.bf16.msra.mxu1 %v2441_v36  ;;  %v287_v36 = vld [vmem:[%s2874_s24 + $0x18] sm:$0xff]  ;;  %v414_v47 = vpack.c.bf16 %v295_v45, %v288_v44  ;;  %v380_v44 = vld [vmem:[%s2874_s24 + $0x300] sm:$0xff] }
  0xa1   : > { %2025 = vmatprep.subr.bf16.mxu1 %v2442_v42  ;;  %2094 = vmatpush3.bf16.msra.mxu0 %v2448_v48  ;;  %v415_v42 = vpack.c.bf16 %v296_v40, %v289_v39  ;;  %v413_v43 = vpack.c.bf16 %v294_v37, %v287_v36  ;;  %v303_v48 = vld [vmem:[%s2874_s24 + $0x98] sm:$0xff]  ;;  %v342_v36 = vld [vmem:[%s2874_s24 + $0x1d0] sm:$0xff]  ;;  %v349_v37 = vld [vmem:[%s2874_s24 + $0x208] sm:$0xff] }
  0xa2   : > { %2095 = vmatprep.subr.bf16.mxu0 %v2450_v49  ;;  %v310_v49 = vld [vmem:[%s2874_s24 + $0xd0] sm:$0xff]  ;;  %v364_v39 = vld [vmem:[%s2874_s24 + $0x280] sm:$0xff] }
  0xa3   : > { %973 = vmatmul.mubr.bf16.gmra.mrb[4].mxu1 %v445_v50  ;;  %941 = vmatmul.mubr.bf16.gmra.mrb[4].mxu0 %v417_v51  ;;  %v422_v50 = vpack.c.bf16 %v310_v49, %v303_v48  ;;  %v286_v51 = vld [vmem:[%s2874_s24 + $0x10] sm:$0xff]  ;;  %v356_v49 = vld [vmem:[%s2874_s24 + $0x240] sm:$0xff] }
  0xa4   : > { %2026 = vmatpush3.bf16.msra.mxu1 %v2444_v52  ;;  %980 = vmatprep.mubr.bf16.mxu1 %v453_v53  ;;  %v293_v52 = vld [vmem:[%s2874_s24 + $0x48] sm:$0xff]  ;;  %v358_v40 = vld [vmem:[%s2874_s24 + $0x250] sm:$0xff] }
  0xa5   : > { %2027 = vmatprep.subr.bf16.mxu1 %v2447_v54  ;;  %2096 = vmatpush3.bf16.msra.mxu0 %v2451_v55  ;;  %v301_v53 = vld [vmem:[%s2874_s24 + $0x88] sm:$0xff]  ;;  %v308_v54 = vld [vmem:[%s2874_s24 + $0xc0] sm:$0xff]  ;;  %v302_v55 = vld [vmem:[%s2874_s24 + $0x90] sm:$0xff]  ;;  %v412_v57 = vpack.c.bf16 %v293_v52, %v286_v51 }
  0xa6   : > { %2097 = vmatprep.subr.bf16.mxu0 %v2454_v59  ;;  %948 = vmatprep.mubr.bf16.mxu0 %v425_v2  ;;  %v324_v59 = vld [vmem:[%s2874_s24 + $0x140] sm:$0xff]  ;;  %v420_v61 = vpack.c.bf16 %v308_v54, %v301_v53  ;;  %v421_v62 = vpack.c.bf16 %v309_v56, %v302_v55  ;;  %v315_v2 = vld [vmem:[%s2874_s24 + $0xf8] sm:$0xff]  ;;  %v378_v52 = vld [vmem:[%s2874_s24 + $0x2f0] sm:$0xff] }
  0xa7   : > { %v371_v51 = vld [vmem:[%s2874_s24 + $0x2b8] sm:$0xff]  ;;  %v372_v53 = vld [vmem:[%s2874_s24 + $0x2c0] sm:$0xff] }
  0xa8   : > { %2028 = vmatpush3.bf16.msra.mxu1 %v2449_v58  ;;  %v317_v58 = vld [vmem:[%s2874_s24 + $0x108] sm:$0xff]  ;;  %v379_v54 = vld [vmem:[%s2874_s24 + $0x2f8] sm:$0xff] }
  0xa9   : > { %2029 = vmatprep.subr.bf16.mxu1 %v2452_v60  ;;  %2098 = vmatpush3.bf16.msra.mxu0 %v2455_v1  ;;  %v2470_v60 = vld [vmem:[%s3513_s1 + $0x180] sm:$0xff]   ;;  %v429_v63 = vpack.c.bf16 %v324_v59, %v317_v58  ;;  %v307_v1 = vld [vmem:[%s2874_s24 + $0xb8] sm:$0xff]  ;;  %v455_v58 = vpack.c.bf16 %v378_v52, %v371_v51  ;;  %v456_v59 = vpack.c.bf16 %v379_v54, %v372_v53  ;;  %v409_v51 = vld [vmem:[%s2874_s24 + $0x3e8] sm:$0xff] }
  0xaa   : > { %2099 = vmatprep.subr.bf16.mxu0 %v2458_v8  ;;  %v338_v8 = vld [vmem:[%s2874_s24 + $0x1b0] sm:$0xff]  ;;  %v387_v56 = vld [vmem:[%s2874_s24 + $0x338] sm:$0xff] }
  0xab   : > { %981 = vmatmul.mubr.bf16.gmra.mrb[8].mxu1 %v452_v6  ;;  %949 = vmatmul.mubr.bf16.gmra.mrb[8].mxu0 %v424_v7  ;;  %v419_v6 = vpack.c.bf16 %v307_v1, %v300_v0  ;;  %v331_v7 = vld [vmem:[%s2874_s24 + $0x178] sm:$0xff]  ;;  %v392_v0 = vld [vmem:[%s2874_s24 + $0x360] sm:$0xff]  ;;  %v386_v1 = vld [vmem:[%s2874_s24 + $0x330] sm:$0xff] }
  0xac   : > { %2030 = vmatpush3.bf16.msra.mxu1 %v2453_v5  ;;  %988 = vmatprep.mubr.bf16.mxu1 %v460_v9  ;;  %v323_v5 = vld [vmem:[%s2874_s24 + $0x138] sm:$0xff]  ;;  %v427_v9 = vpack.c.bf16 %v322_v3, %v315_v2  ;;  %v393_v2 = vld [vmem:[%s2874_s24 + $0x368] sm:$0xff]  ;;  %v2475_v52 = vld [vmem:[%s3515_s3 + $0x20] sm:$0xff]  }
  0xad   : > { %2031 = vmatprep.subr.bf16.mxu1 %v2456_v10  ;;  %2100 = vmatpush3.bf16.msra.mxu0 %v2459_v11  ;;  %v428_v10 = vpack.c.bf16 %v323_v5, %v316_v4  ;;  %v436_v11 = vpack.c.bf16 %v338_v8, %v331_v7  ;;  %v401_v4 = vld [vmem:[%s2874_s24 + $0x3a8] sm:$0xff]  ;;  %v408_v5 = vld [vmem:[%s2874_s24 + $0x3e0] sm:$0xff]  ;;  %v463_v7 = vpack.c.bf16 %v393_v2, %v386_v1 }
  0xae   : > { %2101 = vmatprep.subr.bf16.mxu0 %v2461_v15  ;;  %956 = vmatprep.mubr.bf16.mxu0 %v432_v26  ;;  %v336_v15 = vld [vmem:[%s2874_s24 + $0x1a0] sm:$0xff]  ;;  %v343_v26 = vld [vmem:[%s2874_s24 + $0x1d8] sm:$0xff]  ;;  %v471_v8 = vpack.c.bf16 %v408_v5, %v401_v4 }
  0xaf   : > { %v2476_v54 = vld [vmem:[%s3515_s3 + $0x28] sm:$0xff]  }
  0xb0   : > { %2032 = vmatpush3.bf16.msra.mxu1 %v2457_v14  ;;  %v329_v14 = vld [vmem:[%s2874_s24 + $0x168] sm:$0xff] }
  0xb1   : > { %2033 = vmatprep.subr.bf16.mxu1 %v2460_v16  ;;  %2102 = vmatpush3.bf16.msra.mxu0 %v2463_v19  ;;  %v330_v16 = vld [vmem:[%s2874_s24 + $0x170] sm:$0xff]  ;;  %v345_v19 = vld [vmem:[%s2874_s24 + $0x1e8] sm:$0xff] }
  0xb2   : > { %2103 = vmatprep.subr.bf16.mxu0 %v2464_v28  ;;  %v435_v22 = vpack.c.bf16 %v337_v17, %v330_v16  ;;  %v443_v24 = vpack.c.bf16 %v352_v20, %v345_v19  ;;  %v344_v28 = vld [vmem:[%s2874_s24 + $0x1e0] sm:$0xff]  ;;  %v405_v19 = vld [vmem:[%s2874_s24 + $0x3c8] sm:$0xff] }
  0xb3   : > { %989 = vmatmul.mubr.bf16.gmra.mrb[12].mxu1 %v459_v25  ;;  %957 = vmatmul.mubr.bf16.gmra.mrb[12].mxu0 %v431_v27  ;;  %v335_v25 = vld [vmem:[%s2874_s24 + $0x198] sm:$0xff]  ;;  %v350_v27 = vld [vmem:[%s2874_s24 + $0x210] sm:$0xff] }
  0xb4   : > { %996 = vmatprep.mubr.bf16.mxu1 %v467_v29  ;;  %2034 = vmatpush3.bf16.msra.mxu1 %v2462_v21  ;;  %v434_v21 = vpack.c.bf16 %v336_v15, %v329_v14  ;;  %v351_v29 = vld [vmem:[%s2874_s24 + $0x218] sm:$0xff]  ;;  %v433_v32 = vpack.c.bf16 %v335_v25, %v328_v23  ;;  %v441_v33 = vpack.c.bf16 %v350_v27, %v343_v26  ;;  %v318_v27 = vld [vmem:[%s2874_s24 + $0x110] sm:$0xff] }
  0xb5   : > { %2035 = vmatprep.subr.bf16.mxu1 %v2465_v30  ;;  %2104 = vmatpush3.bf16.msra.mxu0 %v2466_v31  ;;  %v359_v30 = vld [vmem:[%s2874_s24 + $0x258] sm:$0xff]  ;;  %v366_v31 = vld [vmem:[%s2874_s24 + $0x290] sm:$0xff] }
  0xb6   : > { %2105 = vmatprep.subr.bf16.mxu0 %v2468_v34  ;;  %1142 = vmatprep.mubr.bf16.mxu0 %v415_v42  ;;  %v442_v34 = vpack.c.bf16 %v351_v29, %v344_v28  ;;  %v440_v42 = vpack.c.bf16 %v349_v37, %v342_v36  ;;  %v407_v14 = vld [vmem:[%s2874_s24 + $0x3d8] sm:$0xff]  ;;  %v325_v28 = vld [vmem:[%s2874_s24 + $0x148] sm:$0xff]  ;;  %v360_v37 = vld [vmem:[%s2874_s24 + $0x260] sm:$0xff] }
  0xb7   : > { %v470_v17 = vpack.c.bf16 %v407_v14, %v400_v13  ;;  %v311_v25 = vld [vmem:[%s2874_s24 + $0xd8] sm:$0xff]  ;;  %v430_v29 = vpack.c.bf16 %v325_v28, %v318_v27 }
  0xb8   : > { %2036 = vmatpush3.bf16.msra.mxu1 %v2467_v35  ;;  %v450_v35 = vpack.c.bf16 %v366_v31, %v359_v30  ;;  %v332_v30 = vld [vmem:[%s2874_s24 + $0x180] sm:$0xff]  ;;  %v339_v31 = vld [vmem:[%s2874_s24 + $0x1b8] sm:$0xff] }
  0xb9   : > { %2106 = vmatpush3.bf16.msra.mxu0 %v2469_v38  ;;  %2188 = vmatprep.subr.bf16.mxu1 %v2676_v46  ;;  %v357_v38 = vld [vmem:[%s2874_s24 + $0x248] sm:$0xff] }
  0xba   : > { %2226 = vmatprep.subr.bf16.mxu0 %v2676_v46  ;;  %v448_v45 = vpack.c.bf16 %v364_v39, %v357_v38  ;;  %v367_v38 = vld [vmem:[%s2874_s24 + $0x298] sm:$0xff] }
  0xbb   : > { %997 = vmatmul.mubr.bf16.gmra.mrb[16].mxu1 %v466_v41  ;;  %v365_v41 = vld [vmem:[%s2874_s24 + $0x288] sm:$0xff] }
  0xbc   : > { %1037 = vmatprep.mubr.bf16.mxu1 %v413_v43  ;;  %1143 = vmatmul.mubr.bf16.vlgmr.msra.gmra.mrb[16].mxu0 %v414_v47  ;;  %v373_v43 = vld [vmem:[%s2874_s24 + $0x2c8] sm:$0xff]  ;;  %v449_v47 = vpack.c.bf16 %v365_v41, %v358_v40  ;;  %v451_v40 = vpack.c.bf16 %v367_v38, %v360_v37  ;;  %v374_v41 = vld [vmem:[%s2874_s24 + $0x2d0] sm:$0xff] }
  0xbd   : > { %1150 = vmatprep.mubr.bf16.mxu0 %v422_v50  ;;  %v457_v48 = vpack.c.bf16 %v380_v44, %v373_v43  ;;  %v363_v50 = vld [vmem:[%s2874_s24 + $0x278] sm:$0xff]  ;;  %v2473_v43 = vld [vmem:[%s3515_s3 + $0x10] sm:$0xff]  }
  0xbe   : > { %v447_v55 = vpack.c.bf16 %v363_v50, %v356_v49  ;;  %v2472_v39 = vld [vmem:[%s3515_s3 + $0x8] sm:$0xff]   ;;  %v402_v50 = vld [vmem:[%s2874_s24 + $0x3b0] sm:$0xff] }
  0xbf   : > { %v472_v53 = vpack.c.bf16 %v409_v51, %v402_v50 }
  0xc3   : > { %1038 = vmatmul.mubr.bf16.vlgmr.msra.gmra.mrb[20].mxu1 %v412_v57  ;;  %v394_v57 = vld [vmem:[%s2874_s24 + $0x370] sm:$0xff] }
  0xc4   : > { %2189 = vmatpush3.bf16.msra.mxu1 %v2470_v60  ;;  %1045 = vmatprep.mubr.bf16.mxu1 %v420_v61  ;;  %v464_v60 = vpack.c.bf16 %v394_v57, %v387_v56  ;;  %v370_v61 = vld [vmem:[%s2874_s24 + $0x2b0] sm:$0xff]  ;;  %v2478_v56 = vld [vmem:[%s3515_s3 + $0x38] sm:$0xff]  }
  0xc5   : > { %1151 = vmatmul.mubr.bf16.gmra.mrb[20].mxu0 %v421_v62  ;;  %v377_v62 = vld [vmem:[%s2874_s24 + $0x2e8] sm:$0xff] }
  0xc6   : > { %1158 = vmatprep.mubr.bf16.mxu0 %v429_v63  ;;  %v385_v63 = vld [vmem:[%s2874_s24 + $0x328] sm:$0xff]  ;;  %v454_v3 = vpack.c.bf16 %v377_v62, %v370_v61 }
  0xcb   : > { %1046 = vmatmul.mubr.bf16.gmra.mrb[24].mxu1 %v419_v6  ;;  %v462_v6 = vpack.c.bf16 %v392_v0, %v385_v63 }
  0xcc   : > { %1053 = vmatprep.mubr.bf16.mxu1 %v427_v9  ;;  %v384_v9 = vld [vmem:[%s2874_s24 + $0x320] sm:$0xff] }
  0xcd   : > { %1159 = vmatmul.mubr.bf16.gmra.mrb[24].mxu0 %v428_v10  ;;  %v391_v10 = vld [vmem:[%s2874_s24 + $0x358] sm:$0xff] }
  0xce   : > { %1166 = vmatprep.mubr.bf16.mxu0 %v436_v11  ;;  %v399_v11 = vld [vmem:[%s2874_s24 + $0x398] sm:$0xff]  ;;  %v461_v15 = vpack.c.bf16 %v391_v10, %v384_v9 }
  0xcf   : > { %v469_v16 = vpack.c.bf16 %v406_v12, %v399_v11 }
  0xd3   : > { %1054 = vmatmul.mubr.bf16.gmra.mrb[28].mxu1 %v426_v18  ;;  %v398_v18 = vld [vmem:[%s2874_s24 + $0x390] sm:$0xff] }
  0xd4   : > { %1061 = vmatprep.mubr.bf16.mxu1 %v434_v21  ;;  %v468_v20 = vpack.c.bf16 %v405_v19, %v398_v18  ;;  %v290_v21 = vld [vmem:[%s2874_s24 + $0x30] sm:$0xff] }
  0xd5   : > { %1167 = vmatmul.mubr.bf16.gmra.mrb[28].mxu0 %v435_v22  ;;  %v297_v22 = vld [vmem:[%s2874_s24 + $0x68] sm:$0xff] }
  0xd6   : > { %1174 = vmatprep.mubr.bf16.mxu0 %v443_v24  ;;  %v416_v23 = vpack.c.bf16 %v297_v22, %v290_v21  ;;  %v304_v24 = vld [vmem:[%s2874_s24 + $0xa0] sm:$0xff] }
  0xd7   : > { %v423_v26 = vpack.c.bf16 %v311_v25, %v304_v24 }
  0xdb   : > { %1062 = vmatmul.mubr.bf16.gmra.mrb[32].mxu1 %v433_v32  ;;  %v437_v32 = vpack.c.bf16 %v339_v31, %v332_v30 }
  0xdc   : > { %1069 = vmatprep.mubr.bf16.mxu1 %v441_v33  ;;  %v2471_v33 = vld [vmem:[%s3515_s3] sm:$0xff]  }
  0xdd   : > { %1175 = vmatmul.mubr.bf16.gmra.mrb[32].mxu0 %v442_v34  ;;  %v346_v34 = vld [vmem:[%s2874_s24 + $0x1f0] sm:$0xff] }
  0xde   : > { %1182 = vmatprep.mubr.bf16.mxu0 %v450_v35  ;;  %v353_v35 = vld [vmem:[%s2874_s24 + $0x228] sm:$0xff]  ;;  %2227 = vmatpush3.bf16.msra.mxu0 %v2471_v33 }
  0xdf   : > { %2228 = vmatprep.subr.bf16.mxu0 %v2676_v46  ;;  %v444_v36 = vpack.c.bf16 %v353_v35, %v346_v34 }
  0xe2   : > { %2229 = vmatpush3.bf16.msra.mxu0 %v2472_v39 }
  0xe3   : > { %1070 = vmatmul.mubr.bf16.gmra.mrb[36].mxu1 %v440_v42  ;;  %2230 = vmatprep.subr.bf16.mxu0 %v2676_v46  ;;  %v381_v42 = vld [vmem:[%s2874_s24 + $0x308] sm:$0xff] }
  0xe4   : > { %1077 = vmatprep.mubr.bf16.mxu1 %v448_v45  ;;  %v458_v44 = vpack.c.bf16 %v381_v42, %v374_v41  ;;  %v388_v45 = vld [vmem:[%s2874_s24 + $0x340] sm:$0xff] }
  0xe5   : > { %1183 = vmatmul.mubr.bf16.gmra.mrb[36].mxu0 %v449_v47  ;;  %v395_v47 = vld [vmem:[%s2874_s24 + $0x378] sm:$0xff] }
  0xe6   : > { %1190 = vmatprep.mubr.bf16.mxu0 %v457_v48  ;;  %2231 = vmatpush3.bf16.msra.mxu0 %v2473_v43  ;;  %v2474_v48 = vld [vmem:[%s3515_s3 + $0x18] sm:$0xff]   ;;  %v465_v49 = vpack.c.bf16 %v395_v47, %v388_v45 }
  0xe7   : > { %2232 = vmatprep.subr.bf16.mxu0 %v2676_v46 }
  0xea   : > { %2233 = vmatpush3.bf16.msra.mxu0 %v2474_v48  ;;  %v3243_v48 = vld [vmem:[#allocation4] ss:$0 sm:$0xff] }
  0xeb   : > { %1078 = vmatmul.mubr.bf16.gmra.mrb[40].mxu1 %v447_v55  ;;  %2234 = vmatprep.subr.bf16.mxu0 %v2676_v46  ;;  %v2477_v55 = vld [vmem:[%s3515_s3 + $0x30] sm:$0xff]  }
  0xec   : > { %1085 = vmatprep.mubr.bf16.mxu1 %v455_v58 }
  0xed   : > { %1191 = vmatmul.mubr.bf16.gmra.mrb[40].mxu0 %v456_v59 }
  0xee   : > { %1198 = vmatprep.mubr.bf16.mxu0 %v464_v60  ;;  %2235 = vmatpush3.bf16.msra.mxu0 %v2475_v52 }
  0xef   : > { %2236 = vmatprep.subr.bf16.mxu0 %v2676_v46 }
  0xf2   : > { %2237 = vmatpush3.bf16.msra.mxu0 %v2476_v54 }
  0xf3   : > { %1086 = vmatmul.mubr.bf16.gmra.mrb[44].mxu1 %v454_v3  ;;  %2238 = vmatprep.subr.bf16.mxu0 %v2676_v46 }
  0xf4   : > { %1093 = vmatprep.mubr.bf16.mxu1 %v462_v6 }
  0xf5   : > { %1199 = vmatmul.mubr.bf16.gmra.mrb[44].mxu0 %v463_v7 }
  0xf6   : > { %1206 = vmatprep.mubr.bf16.mxu0 %v471_v8  ;;  %2239 = vmatpush3.bf16.msra.mxu0 %v2477_v55 }
  0xf7   : > { %2240 = vmatprep.subr.bf16.mxu0 %v2676_v46 }
  0xfa   : > { %2241 = vmatpush3.bf16.msra.mxu0 %v2478_v56 }
  0xfb   : > { %1094 = vmatmul.mubr.bf16.gmra.mrb[48].mxu1 %v461_v15 }
  0xfc   : > { %1101 = vmatprep.mubr.bf16.mxu1 %v469_v16 }
  0xfd   : > { %1207 = vmatmul.mubr.bf16.gmra.mrb[48].mxu0 %v470_v17 }
  0xfe   : > { %2242 = vmatprep.mubr.msk.bf16.mxu0 %vm2677_vm0, %v2676_v46 }
 0x103   : > { %1102 = vmatmul.mubr.bf16.gmra.mrb[52].mxu1 %v468_v20 }
 0x104   : > { %2190 = vmatprep.mubr.msk.bf16.mxu1 %vm2677_vm0, %v2676_v46 }
 0x10b   : > { %2191 = vmatmul.mubr.msk.bf16.vlgmr.msra.gmra.mrb[56].mxu1 %vm872_vm1, %v416_v23 }
 0x10c   : > { %2194 = vmatprep.mubr.msk.bf16.mxu1 %vm2677_vm0, %v2676_v46 }
 0x113   : > { %2195 = vmatmul.mubr.msk.bf16.gmra.mrb[60].mxu1 %vm872_vm1, %v423_v26 }
 0x114   : > { %2198 = vmatprep.mubr.msk.bf16.mxu1 %vm2677_vm0, %v2676_v46 }
 0x11b   : > { %2199 = vmatmul.mubr.msk.bf16.gmra.mrb[64].mxu1 %vm872_vm1, %v430_v29 }
 0x11c   : > { %2202 = vmatprep.mubr.msk.bf16.mxu1 %vm2677_vm0, %v2676_v46 }
 0x123   : > { %2203 = vmatmul.mubr.msk.bf16.gmra.mrb[68].mxu1 %vm872_vm1, %v437_v32 }
 0x124   : > { %2206 = vmatprep.mubr.msk.bf16.mxu1 %vm2677_vm0, %v2676_v46 }
 0x12b   : > { %2207 = vmatmul.mubr.msk.bf16.gmra.mrb[72].mxu1 %vm872_vm1, %v444_v36 }
 0x12c   : > { %2210 = vmatprep.mubr.msk.bf16.mxu1 %vm2677_vm0, %v2676_v46 }
 0x133   : > { %2211 = vmatmul.mubr.msk.bf16.gmra.mrb[76].mxu1 %vm872_vm1, %v451_v40 }
 0x134   : > { %2214 = vmatprep.mubr.msk.bf16.mxu1 %vm2677_vm0, %v2676_v46 }
 0x13b   : > { %2215 = vmatmul.mubr.msk.bf16.gmra.mrb[80].mxu1 %vm872_vm1, %v458_v44 }
 0x13c   : > { %2218 = vmatprep.mubr.msk.bf16.mxu1 %vm2677_vm0, %v2676_v46 }
 0x143   : > { %2219 = vmatmul.mubr.msk.bf16.gmra.mrb[84].mxu1 %vm872_vm1, %v465_v49 }
 0x144   : > { %2222 = vmatprep.mubr.msk.bf16.mxu1 %vm2677_vm0, %v2676_v46 }
 0x14b   : > { %2223 = vmatmul.mubr.msk.bf16.gmra.mrb[88].mxu1 %vm872_vm1, %v472_v53 }
 0x16e   : > { %v1991_v57 = vpop.f32.mrb[0].mxu1  ;;  %v1967_v58 = vpop.f32.mrb[0].mxu0 }
 0x16f   : > { %v1992_v59 = vpop.f32.mrb[1].mxu1  ;;  %v1968_v60 = vpop.f32.mrb[1].mxu0 }
 0x170   : > { %v3219_v61 = vadd.f32 %v1992_v59, %v1991_v57  ;;  %v1994_v62 = vpop.f32.mrb[2].mxu1  ;;  %v1969_v63 = vadd.f32 %v1968_v60, %v1967_v58  ;;  %v1970_v0 = vpop.f32.mrb[2].mxu0 }
 0x171   : > { %v1995_v1 = vpop.f32.mrb[3].mxu1  ;;  %v1971_v2 = vpop.f32.mrb[3].mxu0 }
 0x172   : > { %v3221_v3 = vadd.f32 %v1995_v1, %v1994_v62  ;;  %v1972_v4 = vadd.f32 %v1971_v2, %v1970_v0  ;;  %v935_v57 = vadd.f32 %v1969_v63, %v3243_v48 }
 0x174   : > { %v938_v60 = vadd.f32 %v1972_v4, %v3243_v48 }
 0x176   : > { %v1997_v5 = vpop.f32.mrb[4].mxu1  ;;  %v1973_v6 = vpop.f32.mrb[4].mxu0 }
 0x177   : > { %v1998_v7 = vpop.f32.mrb[5].mxu1  ;;  %v1974_v8 = vpop.f32.mrb[5].mxu0 }
 0x178   : > { %v3223_v9 = vadd.f32 %v1998_v7, %v1997_v5  ;;  %v2000_v10 = vpop.f32.mrb[6].mxu1  ;;  %v1975_v11 = vadd.f32 %v1974_v8, %v1973_v6  ;;  %v1976_v12 = vpop.f32.mrb[6].mxu0 }
 0x179   : > { %v2001_v13 = vpop.f32.mrb[7].mxu1  ;;  %v1977_v14 = vpop.f32.mrb[7].mxu0 }
 0x17a   : > { %v3225_v15 = vadd.f32 %v2001_v13, %v2000_v10  ;;  %v1978_v16 = vadd.f32 %v1977_v14, %v1976_v12  ;;  %v943_v63 = vadd.f32 %v1975_v11, %v3243_v48 }
 0x17e   : > { %v2003_v17 = vpop.f32.mrb[8].mxu1  ;;  %v1979_v18 = vpop.f32.mrb[8].mxu0 }
 0x17f   : > { %v2004_v19 = vpop.f32.mrb[9].mxu1  ;;  %v1980_v20 = vpop.f32.mrb[9].mxu0 }
 0x180   : > { %v3227_v21 = vadd.f32 %v2004_v19, %v2003_v17  ;;  %v2006_v22 = vpop.f32.mrb[10].mxu1  ;;  %v3229_v23 = vadd.f32 %v1980_v20, %v1979_v18  ;;  %v1982_v24 = vpop.f32.mrb[10].mxu0  ;;  %v946_v20 = vadd.f32 %v1978_v16, %v3243_v48 }
 0x181   : > { %v2007_v25 = vpop.f32.mrb[11].mxu1  ;;  %v1983_v26 = vpop.f32.mrb[11].mxu0 }
 0x182   : > { %v3231_v27 = vadd.f32 %v2007_v25, %v2006_v22  ;;  %v3233_v28 = vadd.f32 %v1983_v26, %v1982_v24  ;;  %v951_v11 = vadd.f32 %v3229_v23, %v3243_v48 }
 0x186   : > { %v2009_v29 = vpop.f32.mrb[12].mxu1  ;;  %v1985_v30 = vpop.f32.mrb[12].mxu0 }
 0x187   : > { %v2010_v31 = vpop.f32.mrb[13].mxu1  ;;  %v1986_v32 = vpop.f32.mrb[13].mxu0 }
 0x188   : > { %v3235_v33 = vadd.f32 %v2010_v31, %v2009_v29  ;;  %v2012_v34 = vpop.f32.mrb[14].mxu1  ;;  %v3237_v35 = vadd.f32 %v1986_v32, %v1985_v30  ;;  %v1988_v36 = vpop.f32.mrb[14].mxu0 }
 0x189   : > { %v2013_v37 = vpop.f32.mrb[15].mxu1  ;;  %v1989_v38 = vpop.f32.mrb[15].mxu0 }
 0x18a   : > { %v3239_v39 = vadd.f32 %v2013_v37, %v2012_v34  ;;  %v3241_v40 = vadd.f32 %v1989_v38, %v1988_v36 }
 0x18e   : > { %v2015_v41 = vpop.f32.mrb[16].mxu1 }
 0x18f   : > { %v2016_v42 = vpop.f32.mrb[17].mxu1  ;;  %v2107_v43 = vpop.f32.mrb[16].mxu0 }
 0x190   : > { %v2017_v44 = vadd.f32 %v2016_v42, %v2015_v41  ;;  %v2018_v45 = vpop.f32.mrb[18].mxu1  ;;  %v2108_v47 = vpop.f32.mrb[17].mxu0 }
 0x191   : > { %v2019_v49 = vpop.f32.mrb[19].mxu1  ;;  %v2109_v50 = vadd.f32 %v2108_v47, %v2107_v43  ;;  %v2110_v51 = vpop.f32.mrb[18].mxu0 }
 0x192   : > { %v3246_v52 = vadd.f32 %v2017_v44, %v3243_v48  ;;  %v2020_v53 = vadd.f32 %v2019_v49, %v2018_v45  ;;  %v2111_v54 = vpop.f32.mrb[19].mxu0  ;;  %v954_v44 = vadd.f32 %v3233_v28, %v3243_v48 }
 0x193   : > { %v2112_v55 = vadd.f32 %v2111_v54, %v2110_v51 }
 0x194   : > { %v3249_v56 = vadd.f32 %v2020_v53, %v3243_v48 }
 0x196   : > { %v2037_v58 = vpop.f32.mrb[20].mxu1 }
 0x197   : > { %v2038_v59 = vpop.f32.mrb[21].mxu1 }
 0x198   : > { %v2039_v62 = vadd.f32 %v2038_v59, %v2037_v58  ;;  %v2040_v0 = vpop.f32.mrb[22].mxu1  ;;  %v2113_v1 = vpop.f32.mrb[20].mxu0 }
 0x199   : > { %v2041_v2 = vpop.f32.mrb[23].mxu1  ;;  %v2114_v5 = vpop.f32.mrb[21].mxu0 }
 0x19a   : > { %v1040_v6 = vadd.f32 %v2039_v62, %v935_v57  ;;  %v2042_v7 = vadd.f32 %v2041_v2, %v2040_v0  ;;  %v2115_v8 = vadd.f32 %v2114_v5, %v2113_v1  ;;  %v2116_v10 = vpop.f32.mrb[22].mxu0  ;;  %v959_v62 = vadd.f32 %v3237_v35, %v3243_v48 }
 0x19b   : > { %v2117_v12 = vpop.f32.mrb[23].mxu0  ;;  %v962_v2 = vadd.f32 %v3241_v40, %v3243_v48  ;;  %v967_v40 = vadd.f32 %v3219_v61, %v3243_v48 }
 0x19c   : > { %v1043_v13 = vadd.f32 %v2042_v7, %v938_v60  ;;  %v2118_v14 = vadd.f32 %v2117_v12, %v2116_v10  ;;  %v3253_v17 = vadd.f32 %v2109_v50, %v1040_v6 }
 0x19e   : > { %v2043_v18 = vpop.f32.mrb[24].mxu1  ;;  %v3256_v19 = vadd.f32 %v2112_v55, %v1043_v13 }
 0x19f   : > { %v2044_v4 = vpop.f32.mrb[25].mxu1 }
 0x1a0   : > { %v2045_v22 = vadd.f32 %v2044_v4, %v2043_v18  ;;  %v2046_v24 = vpop.f32.mrb[26].mxu1  ;;  %v2119_v25 = vpop.f32.mrb[24].mxu0 }
 0x1a1   : > { %v2047_v26 = vpop.f32.mrb[27].mxu1  ;;  %v2120_v29 = vpop.f32.mrb[25].mxu0 }
 0x1a2   : > { %v1048_v30 = vadd.f32 %v2045_v22, %v943_v63  ;;  %v2048_v31 = vadd.f32 %v2047_v26, %v2046_v24  ;;  %v2121_v32 = vadd.f32 %v2120_v29, %v2119_v25  ;;  %v2122_v34 = vpop.f32.mrb[26].mxu0 }
 0x1a3   : > { %v2123_v36 = vpop.f32.mrb[27].mxu0 }
 0x1a4   : > { %v1051_v37 = vadd.f32 %v2048_v31, %v946_v20  ;;  %v2124_v38 = vadd.f32 %v2123_v36, %v2122_v34  ;;  %v3259_v41 = vadd.f32 %v2115_v8, %v1048_v30  ;;  %v970_v34 = vadd.f32 %v3221_v3, %v3243_v48 }
 0x1a6   : > { %v2049_v42 = vpop.f32.mrb[28].mxu1  ;;  %v3263_v43 = vadd.f32 %v2118_v14, %v1051_v37 }
 0x1a7   : > { %v2050_v16 = vpop.f32.mrb[29].mxu1 }
 0x1a8   : > { %v2051_v45 = vadd.f32 %v2050_v16, %v2049_v42  ;;  %v2052_v47 = vpop.f32.mrb[30].mxu1  ;;  %v2125_v49 = vpop.f32.mrb[28].mxu0 }
 0x1a9   : > { %v2053_v50 = vpop.f32.mrb[31].mxu1  ;;  %v2126_v51 = vpop.f32.mrb[29].mxu0 }
 0x1aa   : > { %v1056_v53 = vadd.f32 %v2051_v45, %v951_v11  ;;  %v2054_v54 = vadd.f32 %v2053_v50, %v2052_v47  ;;  %v2127_v55 = vadd.f32 %v2126_v51, %v2125_v49  ;;  %v2128_v57 = vpop.f32.mrb[30].mxu0  ;;  %v975_v50 = vadd.f32 %v3223_v9, %v3243_v48 }
 0x1ab   : > { %v2129_v58 = vpop.f32.mrb[31].mxu0 }
 0x1ac   : > { %v1059_v59 = vadd.f32 %v2054_v54, %v954_v44  ;;  %v2130_v60 = vadd.f32 %v2129_v58, %v2128_v57  ;;  %v3267_v23 = vadd.f32 %v2121_v32, %v1056_v53  ;;  %v978_v57 = vadd.f32 %v3225_v15, %v3243_v48 }
 0x1ae   : > { %v2055_v0 = vpop.f32.mrb[32].mxu1  ;;  %v3271_v1 = vadd.f32 %v2124_v38, %v1059_v59 }
 0x1af   : > { %v2056_v28 = vpop.f32.mrb[33].mxu1 }
 0x1b0   : > { %v2057_v5 = vadd.f32 %v2056_v28, %v2055_v0  ;;  %v2058_v6 = vpop.f32.mrb[34].mxu1  ;;  %v2131_v7 = vpop.f32.mrb[32].mxu0 }
 0x1b1   : > { %v2059_v8 = vpop.f32.mrb[35].mxu1  ;;  %v2132_v10 = vpop.f32.mrb[33].mxu0 }
 0x1b2   : > { %v1064_v12 = vadd.f32 %v2057_v5, %v959_v62  ;;  %v2060_v13 = vadd.f32 %v2059_v8, %v2058_v6  ;;  %v2133_v14 = vadd.f32 %v2132_v10, %v2131_v7  ;;  %v2134_v63 = vpop.f32.mrb[34].mxu0  ;;  %v983_v8 = vadd.f32 %v3227_v21, %v3243_v48 }
 0x1b3   : > { %v2135_v18 = vpop.f32.mrb[35].mxu0 }
 0x1b4   : > { %v1067_v4 = vadd.f32 %v2060_v13, %v962_v2  ;;  %v2136_v20 = vadd.f32 %v2135_v18, %v2134_v63  ;;  %v3275_v35 = vadd.f32 %v2127_v55, %v1064_v12  ;;  %v986_v63 = vadd.f32 %v3231_v27, %v3243_v48 }
 0x1b6   : > { %v2061_v22 = vpop.f32.mrb[36].mxu1  ;;  %v3277_v24 = vadd.f32 %v2130_v60, %v1067_v4 }
 0x1b7   : > { %v2062_v25 = vpop.f32.mrb[37].mxu1 }
 0x1b8   : > { %v2063_v26 = vadd.f32 %v2062_v25, %v2061_v22  ;;  %v2064_v29 = vpop.f32.mrb[38].mxu1  ;;  %v2137_v30 = vpop.f32.mrb[36].mxu0 }
 0x1b9   : > { %v2065_v31 = vpop.f32.mrb[39].mxu1  ;;  %v2138_v32 = vpop.f32.mrb[37].mxu0 }
 0x1ba   : > { %v1072_v36 = vadd.f32 %v2063_v26, %v967_v40  ;;  %v2066_v37 = vadd.f32 %v2065_v31, %v2064_v29  ;;  %v2139_v38 = vadd.f32 %v2138_v32, %v2137_v30  ;;  %v2140_v11 = vpop.f32.mrb[38].mxu0  ;;  %v991_v32 = vadd.f32 %v3235_v33, %v3243_v48 }
 0x1bb   : > { %v2141_v42 = vpop.f32.mrb[39].mxu0 }
 0x1bc   : > { %v1075_v16 = vadd.f32 %v2066_v37, %v970_v34  ;;  %v2142_v44 = vadd.f32 %v2141_v42, %v2140_v11  ;;  %v3283_v45 = vadd.f32 %v2133_v14, %v1072_v36  ;;  %v994_v11 = vadd.f32 %v3239_v39, %v3243_v48 }
 0x1be   : > { %v2067_v47 = vpop.f32.mrb[40].mxu1  ;;  %v3285_v49 = vadd.f32 %v2136_v20, %v1075_v16 }
 0x1bf   : > { %v2068_v61 = vpop.f32.mrb[41].mxu1 }
 0x1c0   : > { %v2069_v51 = vadd.f32 %v2068_v61, %v2067_v47  ;;  %v2070_v53 = vpop.f32.mrb[42].mxu1  ;;  %v2143_v54 = vpop.f32.mrb[40].mxu0 }
 0x1c1   : > { %v2071_v3 = vpop.f32.mrb[43].mxu1  ;;  %v2144_v55 = vpop.f32.mrb[41].mxu0 }
 0x1c2   : > { %v1080_v58 = vadd.f32 %v2069_v51, %v975_v50  ;;  %v2072_v59 = vadd.f32 %v2071_v3, %v2070_v53  ;;  %v2145_v60 = vadd.f32 %v2144_v55, %v2143_v54  ;;  %v2146_v62 = vpop.f32.mrb[42].mxu0 }
 0x1c3   : > { %v2147_v0 = vpop.f32.mrb[43].mxu0 }
 0x1c4   : > { %v1083_v28 = vadd.f32 %v2072_v59, %v978_v57  ;;  %v2148_v2 = vadd.f32 %v2147_v0, %v2146_v62  ;;  %v3291_v5 = vadd.f32 %v2139_v38, %v1080_v58 }
 0x1c6   : > { %v2073_v6 = vpop.f32.mrb[44].mxu1  ;;  %v3293_v7 = vadd.f32 %v2142_v44, %v1083_v28 }
 0x1c7   : > { %v2074_v9 = vpop.f32.mrb[45].mxu1 }
 0x1c8   : > { %v2075_v10 = vadd.f32 %v2074_v9, %v2073_v6  ;;  %v2076_v12 = vpop.f32.mrb[46].mxu1  ;;  %v2149_v13 = vpop.f32.mrb[44].mxu0 }
 0x1c9   : > { %v2077_v15 = vpop.f32.mrb[47].mxu1  ;;  %v2150_v14 = vpop.f32.mrb[45].mxu0 }
 0x1ca   : > { %v1088_v18 = vadd.f32 %v2075_v10, %v983_v8  ;;  %v2078_v4 = vadd.f32 %v2077_v15, %v2076_v12  ;;  %v2151_v20 = vadd.f32 %v2150_v14, %v2149_v13  ;;  %v2152_v22 = vpop.f32.mrb[46].mxu0 }
 0x1cb   : > { %v2153_v25 = vpop.f32.mrb[47].mxu0 }
 0x1cc   : > { %v1091_v40 = vadd.f32 %v2078_v4, %v986_v63  ;;  %v2154_v26 = vadd.f32 %v2153_v25, %v2152_v22  ;;  %v3299_v29 = vadd.f32 %v2145_v60, %v1088_v18 }
 0x1ce   : > { %v2079_v30 = vpop.f32.mrb[48].mxu1  ;;  %v3301_v31 = vadd.f32 %v2148_v2, %v1091_v40 }
 0x1cf   : > { %v2080_v21 = vpop.f32.mrb[49].mxu1 }
 0x1d0   : > { %v2081_v34 = vadd.f32 %v2080_v21, %v2079_v30  ;;  %v2082_v36 = vpop.f32.mrb[50].mxu1  ;;  %v2155_v37 = vpop.f32.mrb[48].mxu0 }
 0x1d1   : > { %v2083_v27 = vpop.f32.mrb[51].mxu1  ;;  %v2156_v38 = vpop.f32.mrb[49].mxu0 }
 0x1d2   : > { %v1096_v42 = vadd.f32 %v2081_v34, %v991_v32  ;;  %v2084_v16 = vadd.f32 %v2083_v27, %v2082_v36  ;;  %v2157_v44 = vadd.f32 %v2156_v38, %v2155_v37  ;;  %v2158_v47 = vpop.f32.mrb[50].mxu0 }
 0x1d3   : > { %v2159_v61 = vpop.f32.mrb[51].mxu0 }
 0x1d4   : > { %v1099_v50 = vadd.f32 %v2084_v16, %v994_v11  ;;  %v2160_v51 = vadd.f32 %v2159_v61, %v2158_v47  ;;  %v3307_v53 = vadd.f32 %v2151_v20, %v1096_v42 }
 0x1d6   : > { %v2085_v54 = vpop.f32.mrb[52].mxu1  ;;  %v3309_v3 = vadd.f32 %v2154_v26, %v1099_v50 }
 0x1d7   : > { %v2086_v33 = vpop.f32.mrb[53].mxu1 }
 0x1d8   : > { %v2087_v55 = vadd.f32 %v2086_v33, %v2085_v54  ;;  %v2088_v57 = vpop.f32.mrb[54].mxu1 }
 0x1d9   : > { %v2089_v58 = vpop.f32.mrb[55].mxu1 }
 0x1da   : > { %v1104_v59 = vadd.f32 %v2087_v55, %v3246_v52  ;;  %v2090_v60 = vadd.f32 %v2089_v58, %v2088_v57 }
 0x1dc   : > { %v1107_v39 = vadd.f32 %v2090_v60, %v3249_v56  ;;  %v3313_v48 = vadd.f32 %v2157_v44, %v1104_v59 }
 0x1de   : > { %v1249_v62 = vpop.f32.mrb[56].mxu1  ;;  %v3315_v0 = vadd.f32 %v2160_v51, %v1107_v39 }
 0x1df   : > { %v1250_v28 = vadd.f32 %v1249_v62, %v3253_v17  ;;  %v2192_v2 = vpop.f32.mrb[57].mxu1 }
 0x1e0   : > { %v1252_v6 = vpop.f32.mrb[58].mxu1 }
 0x1e1   : > { %v1253_v9 = vadd.f32 %v1252_v6, %v3256_v19  ;;  %v2193_v8 = vpop.f32.mrb[59].mxu1  ;;  %v1320_v10 = vmax.f32 %v1250_v28, 0.0 }
 0x1e3   : > { %v1321_v12 = vmax.f32 %v1253_v9, 0.0 }
 0x1e5   : > { %v1338_v13 = vpack.c.bf16 %v1321_v12, %v1320_v10 }
 0x1e6   : > { %v1257_v15 = vpop.f32.mrb[60].mxu1 }
 0x1e7   : > { %v1258_v52 = vadd.f32 %v1257_v15, %v3259_v41  ;;  %v2196_v14 = vpop.f32.mrb[61].mxu1  ;;  %2243 = vmatmul.mubr.bf16.vlgmr.msra.gmra.mrb[52].mxu0 %v1338_v13 }
 0x1e8   : > { %v1260_v56 = vpop.f32.mrb[62].mxu1  ;;  %2246 = vmatprep.mubr.msk.bf16.mxu0 %vm2677_vm0, %v2676_v46 }
 0x1e9   : > { %v1261_v63 = vadd.f32 %v1260_v56, %v3263_v43  ;;  %v2197_v17 = vpop.f32.mrb[63].mxu1  ;;  %v1322_v18 = vmax.f32 %v1258_v52, 0.0 }
 0x1eb   : > { %v1323_v4 = vmax.f32 %v1261_v63, 0.0 }
 0x1ed   : > { %v1339_v20 = vpack.c.bf16 %v1323_v4, %v1322_v18 }
 0x1ee   : > { %v1265_v19 = vpop.f32.mrb[64].mxu1 }
 0x1ef   : > { %v1266_v22 = vadd.f32 %v1265_v19, %v3267_v23  ;;  %v2200_v25 = vpop.f32.mrb[65].mxu1  ;;  %2247 = vmatmul.mubr.bf16.gmra.mrb[56].mxu0 %v1339_v20 }
 0x1f0   : > { %v1268_v40 = vpop.f32.mrb[66].mxu1  ;;  %2250 = vmatprep.mubr.msk.bf16.mxu0 %vm2677_vm0, %v2676_v46  ;;  %v3352_v25 = vld [vmem:[#allocation6] ss:$0 sm:$0xff] }
 0x1f1   : > { %v1269_v41 = vadd.f32 %v1268_v40, %v3271_v1  ;;  %v2201_v26 = vpop.f32.mrb[67].mxu1  ;;  %v1324_v30 = vmax.f32 %v1266_v22, 0.0 }
 0x1f3   : > { %v1325_v21 = vmax.f32 %v1269_v41, 0.0 }
 0x1f5   : > { %v1340_v32 = vpack.c.bf16 %v1325_v21, %v1324_v30 }
 0x1f6   : > { %v1273_v43 = vpop.f32.mrb[68].mxu1 }
 0x1f7   : > { %v1274_v34 = vadd.f32 %v1273_v43, %v3275_v35  ;;  %v2204_v36 = vpop.f32.mrb[69].mxu1  ;;  %2251 = vmatmul.mubr.bf16.gmra.mrb[60].mxu0 %v1340_v32 }
 0x1f8   : > { %v1276_v37 = vpop.f32.mrb[70].mxu1  ;;  %2254 = vmatprep.mubr.msk.bf16.mxu0 %vm2677_vm0, %v2676_v46 }
 0x1f9   : > { %v1277_v23 = vadd.f32 %v1276_v37, %v3277_v24  ;;  %v2205_v27 = vpop.f32.mrb[71].mxu1  ;;  %v1326_v38 = vmax.f32 %v1274_v34, 0.0 }
 0x1fb   : > { %v1327_v11 = vmax.f32 %v1277_v23, 0.0 }
 0x1fd   : > { %v1341_v42 = vpack.c.bf16 %v1327_v11, %v1326_v38 }
 0x1fe   : > { %v1281_v1 = vpop.f32.mrb[72].mxu1 }
 0x1ff   : > { %v1282_v16 = vadd.f32 %v1281_v1, %v3283_v45  ;;  %v2208_v44 = vpop.f32.mrb[73].mxu1  ;;  %2255 = vmatmul.mubr.bf16.gmra.mrb[64].mxu0 %v1341_v42 }
 0x200   : > { %v1284_v47 = vpop.f32.mrb[74].mxu1  ;;  %2258 = vmatprep.mubr.msk.bf16.mxu0 %vm2677_vm0, %v2676_v46 }
 0x201   : > { %v1285_v35 = vadd.f32 %v1284_v47, %v3285_v49  ;;  %v2209_v61 = vpop.f32.mrb[75].mxu1  ;;  %v1328_v50 = vmax.f32 %v1282_v16, 0.0 }
 0x203   : > { %v1329_v51 = vmax.f32 %v1285_v35, 0.0 }
 0x205   : > { %v1342_v54 = vpack.c.bf16 %v1329_v51, %v1328_v50 }
 0x206   : > { %v1289_v24 = vpop.f32.mrb[76].mxu1 }
 0x207   : > { %v1290_v33 = vadd.f32 %v1289_v24, %v3291_v5  ;;  %v2212_v55 = vpop.f32.mrb[77].mxu1  ;;  %2259 = vmatmul.mubr.bf16.gmra.mrb[68].mxu0 %v1342_v54 }
 0x208   : > { %v1292_v57 = vpop.f32.mrb[78].mxu1  ;;  %2262 = vmatprep.mubr.msk.bf16.mxu0 %vm2677_vm0, %v2676_v46 }
 0x209   : > { %v1293_v45 = vadd.f32 %v1292_v57, %v3293_v7  ;;  %v2213_v58 = vpop.f32.mrb[79].mxu1  ;;  %v1330_v59 = vmax.f32 %v1290_v33, 0.0 }
 0x20b   : > { %v1331_v60 = vmax.f32 %v1293_v45, 0.0 }
 0x20d   : > { %v1343_v39 = vpack.c.bf16 %v1331_v60, %v1330_v59 }
 0x20e   : > { %v1297_v49 = vpop.f32.mrb[80].mxu1 }
 0x20f   : > { %v1298_v62 = vadd.f32 %v1297_v49, %v3299_v29  ;;  %v2216_v28 = vpop.f32.mrb[81].mxu1  ;;  %2263 = vmatmul.mubr.bf16.gmra.mrb[72].mxu0 %v1343_v39 }
 0x210   : > { %v1300_v2 = vpop.f32.mrb[82].mxu1  ;;  %2266 = vmatprep.mubr.msk.bf16.mxu0 %vm2677_vm0, %v2676_v46 }
 0x211   : > { %v1301_v5 = vadd.f32 %v1300_v2, %v3301_v31  ;;  %v2217_v6 = vpop.f32.mrb[83].mxu1  ;;  %v1332_v9 = vmax.f32 %v1298_v62, 0.0 }
 0x213   : > { %v1333_v8 = vmax.f32 %v1301_v5, 0.0 }
 0x215   : > { %v1344_v10 = vpack.c.bf16 %v1333_v8, %v1332_v9 }
 0x216   : > { %v1305_v7 = vpop.f32.mrb[84].mxu1 }
 0x217   : > { %v1306_v12 = vadd.f32 %v1305_v7, %v3307_v53  ;;  %v2220_v13 = vpop.f32.mrb[85].mxu1  ;;  %2267 = vmatmul.mubr.bf16.gmra.mrb[76].mxu0 %v1344_v10 }
 0x218   : > { %v1308_v15 = vpop.f32.mrb[86].mxu1  ;;  %2270 = vmatprep.mubr.msk.bf16.mxu0 %vm2677_vm0, %v2676_v46 }
 0x219   : > { %v1309_v29 = vadd.f32 %v1308_v15, %v3309_v3  ;;  %v2221_v52 = vpop.f32.mrb[87].mxu1  ;;  %v1334_v14 = vmax.f32 %v1306_v12, 0.0 }
 0x21b   : > { %v1335_v56 = vmax.f32 %v1309_v29, 0.0 }
 0x21d   : > { %v1345_v31 = vpack.c.bf16 %v1335_v56, %v1334_v14 }
 0x21e   : > { %v1313_v63 = vpop.f32.mrb[88].mxu1 }
 0x21f   : > { %v1314_v17 = vadd.f32 %v1313_v63, %v3313_v48  ;;  %v2224_v18 = vpop.f32.mrb[89].mxu1  ;;  %2271 = vmatmul.mubr.bf16.gmra.mrb[80].mxu0 %v1345_v31 }
 0x220   : > { %v1316_v4 = vpop.f32.mrb[90].mxu1  ;;  %2274 = vmatprep.mubr.msk.bf16.mxu0 %vm2677_vm0, %v2676_v46 }
 0x221   : > { %v1317_v53 = vadd.f32 %v1316_v4, %v3315_v0  ;;  %v2225_v20 = vpop.f32.mrb[91].mxu1  ;;  %v1336_v19 = vmax.f32 %v1314_v17, 0.0 }
 0x223   : > { %v1337_v22 = vmax.f32 %v1317_v53, 0.0 }
 0x225   : > { %v1346_v3 = vpack.c.bf16 %v1337_v22, %v1336_v19 }
 0x227   : > { %2275 = vmatmul.mubr.bf16.gmra.mrb[84].mxu0 %v1346_v3 }
 0x2ba   : > { %v1452_v40 = vpop.f32.mrb[52].mxu0 }
 0x2bb   : > { %v1453_v48 = vadd.f32 %v3352_v25, %v1452_v40  ;;  %v2244_v41 = vpop.f32.mrb[53].mxu0 }
 0x2bc   : > { %v1455_v26 = vpop.f32.mrb[54].mxu0 }
 0x2bd   : > { %1524 = vst.msk [vmem:[%s3355_s9] sm:$0xff] %vm1523_vm2, %v1453_v48  ;;  %v1456_v46 = vadd.f32 %v3352_v25, %v1455_v26  ;;  %v2245_v0 = vpop.f32.mrb[55].mxu0 }
 0x2bf   : > { %1525 = vst.msk [vmem:[%s3355_s9 + $0x8] sm:$0xff] %vm1523_vm2, %v1456_v46 }
 0x2c2   : > { %v1460_v30 = vpop.f32.mrb[56].mxu0 }
 0x2c3   : > { %v1461_v21 = vadd.f32 %v3352_v25, %v1460_v30  ;;  %v2248_v32 = vpop.f32.mrb[57].mxu0 }
 0x2c4   : > { %v1463_v43 = vpop.f32.mrb[58].mxu0 }
 0x2c5   : > { %1526 = vst.msk [vmem:[%s3355_s9 + $0x10] sm:$0xff] %vm1523_vm2, %v1461_v21  ;;  %v1464_v34 = vadd.f32 %v3352_v25, %v1463_v43  ;;  %v2249_v36 = vpop.f32.mrb[59].mxu0 }
 0x2c7   : > { %1527 = vst.msk [vmem:[%s3355_s9 + $0x18] sm:$0xff] %vm1523_vm2, %v1464_v34 }
 0x2ca   : > { %v1468_v37 = vpop.f32.mrb[60].mxu0 }
 0x2cb   : > { %v1469_v23 = vadd.f32 %v3352_v25, %v1468_v37  ;;  %v2252_v27 = vpop.f32.mrb[61].mxu0 }
 0x2cc   : > { %v1471_v38 = vpop.f32.mrb[62].mxu0 }
 0x2cd   : > { %1528 = vst.msk [vmem:[%s3355_s9 + $0x20] sm:$0xff] %vm1523_vm2, %v1469_v23  ;;  %v1472_v11 = vadd.f32 %v3352_v25, %v1471_v38  ;;  %v2253_v42 = vpop.f32.mrb[63].mxu0 }
 0x2cf   : > { %1529 = vst.msk [vmem:[%s3355_s9 + $0x28] sm:$0xff] %vm1523_vm2, %v1472_v11 }
 0x2d2   : > { %v1476_v1 = vpop.f32.mrb[64].mxu0 }
 0x2d3   : > { %v1477_v16 = vadd.f32 %v3352_v25, %v1476_v1  ;;  %v2256_v44 = vpop.f32.mrb[65].mxu0 }
 0x2d4   : > { %v1479_v47 = vpop.f32.mrb[66].mxu0 }
 0x2d5   : > { %1530 = vst.msk [vmem:[%s3355_s9 + $0x30] sm:$0xff] %vm1523_vm2, %v1477_v16  ;;  %v1480_v35 = vadd.f32 %v3352_v25, %v1479_v47  ;;  %v2257_v61 = vpop.f32.mrb[67].mxu0 }
 0x2d7   : > { %1531 = vst.msk [vmem:[%s3355_s9 + $0x38] sm:$0xff] %vm1523_vm2, %v1480_v35 }
 0x2da   : > { %v1484_v50 = vpop.f32.mrb[68].mxu0 }
 0x2db   : > { %v1485_v51 = vadd.f32 %v3352_v25, %v1484_v50  ;;  %v2260_v54 = vpop.f32.mrb[69].mxu0 }
 0x2dc   : > { %v1487_v24 = vpop.f32.mrb[70].mxu0 }
 0x2dd   : > { %1532 = vst.msk [vmem:[%s3355_s9 + $0x40] sm:$0xff] %vm1523_vm2, %v1485_v51  ;;  %v1488_v33 = vadd.f32 %v3352_v25, %v1487_v24  ;;  %v2261_v55 = vpop.f32.mrb[71].mxu0 }
 0x2df   : > { %1533 = vst.msk [vmem:[%s3355_s9 + $0x48] sm:$0xff] %vm1523_vm2, %v1488_v33 }
 0x2e2   : > { %v1492_v57 = vpop.f32.mrb[72].mxu0 }
 0x2e3   : > { %v1493_v45 = vadd.f32 %v3352_v25, %v1492_v57  ;;  %v2264_v58 = vpop.f32.mrb[73].mxu0 }
 0x2e4   : > { %v1495_v59 = vpop.f32.mrb[74].mxu0 }
 0x2e5   : > { %1534 = vst.msk [vmem:[%s3355_s9 + $0x50] sm:$0xff] %vm1523_vm2, %v1493_v45  ;;  %v1496_v60 = vadd.f32 %v3352_v25, %v1495_v59  ;;  %v2265_v39 = vpop.f32.mrb[75].mxu0 }
 0x2e7   : > { %1535 = vst.msk [vmem:[%s3355_s9 + $0x58] sm:$0xff] %vm1523_vm2, %v1496_v60 }
 0x2ea   : > { %v1500_v49 = vpop.f32.mrb[76].mxu0 }
 0x2eb   : > { %v1501_v62 = vadd.f32 %v3352_v25, %v1500_v49  ;;  %v2268_v28 = vpop.f32.mrb[77].mxu0 }
 0x2ec   : > { %v1503_v2 = vpop.f32.mrb[78].mxu0 }
 0x2ed   : > { %1536 = vst.msk [vmem:[%s3355_s9 + $0x60] sm:$0xff] %vm1523_vm2, %v1501_v62  ;;  %v1504_v5 = vadd.f32 %v3352_v25, %v1503_v2  ;;  %v2269_v6 = vpop.f32.mrb[79].mxu0 }
 0x2ef   : > { %1537 = vst.msk [vmem:[%s3355_s9 + $0x68] sm:$0xff] %vm1523_vm2, %v1504_v5 }
 0x2f2   : > { %v1508_v9 = vpop.f32.mrb[80].mxu0 }
 0x2f3   : > { %v1509_v8 = vadd.f32 %v3352_v25, %v1508_v9  ;;  %v2272_v10 = vpop.f32.mrb[81].mxu0 }
 0x2f4   : > { %v1511_v7 = vpop.f32.mrb[82].mxu0 }
 0x2f5   : > { %1538 = vst.msk [vmem:[%s3355_s9 + $0x70] sm:$0xff] %vm1523_vm2, %v1509_v8  ;;  %v1512_v12 = vadd.f32 %v3352_v25, %v1511_v7  ;;  %v2273_v13 = vpop.f32.mrb[83].mxu0 }
 0x2f7   : > { %1539 = vst.msk [vmem:[%s3355_s9 + $0x78] sm:$0xff] %vm1523_vm2, %v1512_v12 }
 0x2f9   : > { %1548 = sbr.rel (!%p3531_p6) target bundleno = 829 (0x33d), region = 56 }
 0x2fa   : > { %v1516_v15 = vpop.f32.mrb[84].mxu0 }
 0x2fb   : > { %v1517_v29 = vadd.f32 %v3352_v25, %v1516_v15  ;;  %v2276_v52 = vpop.f32.mrb[85].mxu0 }
 0x2fc   : > { %v1519_v14 = vpop.f32.mrb[86].mxu0 }
 0x2fd   : > { %1540 = vst.msk [vmem:[%s3355_s9 + $0x80] sm:$0xff] %vm1523_vm2, %v1517_v29  ;;  %v1520_v56 = vadd.f32 %v3352_v25, %v1519_v14  ;;  %v2277_v31 = vpop.f32.mrb[87].mxu0 }
 0x2ff   : > { %1541 = vst.msk [vmem:[%s3355_s9 + $0x88] sm:$0xff] %vm1523_vm2, %v1520_v56 }
 0x300   : > { %s3542_s15 = smov (!%p1551_p7, %s1550_s15), 18 }
 0x301   : > { %s1938_s10 = sshll.u32 %s3542_s15, 7 }
 0x302   : > { %p1941_p9 = scmp.eq.s32.totalorder %s1938_s10, 0 }
 0x303   : > { %2479 = sdivrem.u32 (!%p1941_p9), %s3542_s15, 18 }
 0x304   : > { %1559 = sbr.rel (%p1941_p9) target bundleno = 829 (0x33d), region = 60 }
 0x30c   : > { %s3423_s29 = spop.drf %2479 }
 0x30d   : > { %p1942_p12 = scmp.le.s32.totalorder %s3423_s29, 0 }
 0x30e   : > { %s3532_s22 = smov (!%p1942_p12), %s3417_s30  ;;  %s3533_s13 = smov (!%p1942_p12), %s3355_s9 }
 0x30f   : > { %1792 = sbr.rel (%p1942_p12) target bundleno = 800 (0x320), region = 142  ;;  %s3432_s14 = smov (!%p1942_p12), 0  }
 0x310   : > { %s3434_s7 = smov (!%p1942_p12), 0  }
 0x316 LB: >> { %v1657_v63 = vld [vmem:[%s2645_s13] sm:$0xff]  ;;  %v1659_v17 = vld [vmem:[%s2645_s13 + $0x8] sm:$0xff]  ;;  %v1661_v18 = vld [vmem:[%s2645_s13 + $0x10] sm:$0xff]  ;;  %s1693_s21 = sadd.s32 1, %s2649_s14  ;;  %s1651_s7 = sadd.s32 1, %s2653_s7   ;;  %s2653_s7 = sphi %s3434_s7, %s1651_s7   ;;  %s2649_s14 = sphi %s3432_s14, %s3534_s14   ;;  %s2645_s13 = sphi %s3533_s13, %s1698_s13   ;;  %s2641_s22 = sphi %s3532_s22, %s1699_s22  }
 0x317   : >> { %1658 = vst [vmem:[%s2641_s22] sm:$0xff] %v1657_v63  ;;  %1660 = vst [vmem:[%s2641_s22 + $0x8] sm:$0xff] %v1659_v17  ;;  %v1663_v4 = vld [vmem:[%s2645_s13 + $0x18] sm:$0xff]  ;;  %v1665_v53 = vld [vmem:[%s2645_s13 + $0x20] sm:$0xff]  ;;  %p1694_p0 = scmp.ge.s32.totalorder %s1693_s21, %s3423_s29  ;;  %p1650_p1 = scmp.ge.s32.totalorder %s1651_s7, %s3423_s29 }
 0x318   : >> { %1662 = vst [vmem:[%s2641_s22 + $0x10] sm:$0xff] %v1661_v18  ;;  %v1667_v20 = vld [vmem:[%s2645_s13 + $0x28] sm:$0xff]  ;;  %1664 = vst [vmem:[%s2641_s22 + $0x18] sm:$0xff] %v1663_v4  ;;  %v1669_v19 = vld [vmem:[%s2645_s13 + $0x30] sm:$0xff] }
 0x319   : >> { %1666 = vst [vmem:[%s2641_s22 + $0x20] sm:$0xff] %v1665_v53  ;;  %1668 = vst [vmem:[%s2641_s22 + $0x28] sm:$0xff] %v1667_v20  ;;  %v1671_v22 = vld [vmem:[%s2645_s13 + $0x38] sm:$0xff]  ;;  %v1673_v3 = vld [vmem:[%s2645_s13 + $0x40] sm:$0xff]  ;;  %s3544_s21 = smov (%p1694_p0, %s1693_s21), 0  ;;  %1653 = sbr.rel (!%p1650_p1) target bundleno = 790 (0x316), region = 148 }
 0x31a   : >> { %1670 = vst [vmem:[%s2641_s22 + $0x30] sm:$0xff] %v1669_v19  ;;  %1672 = vst [vmem:[%s2641_s22 + $0x38] sm:$0xff] %v1671_v22  ;;  %v1675_v25 = vld [vmem:[%s2645_s13 + $0x48] sm:$0xff]  ;;  %v1677_v40 = vld [vmem:[%s2645_s13 + $0x50] sm:$0xff]  ;;  %s1696_s28 = smul.u32 144, %s3544_s21  ;;  %s3534_s14 = smov %s3544_s21 }
 0x31b   : >> { %1674 = vst [vmem:[%s2641_s22 + $0x40] sm:$0xff] %v1673_v3  ;;  %v1679_v48 = vld [vmem:[%s2645_s13 + $0x58] sm:$0xff]  ;;  %1676 = vst [vmem:[%s2641_s22 + $0x48] sm:$0xff] %v1675_v25  ;;  %v1681_v41 = vld [vmem:[%s2645_s13 + $0x60] sm:$0xff] }
 0x31c   : >> { %1678 = vst [vmem:[%s2641_s22 + $0x50] sm:$0xff] %v1677_v40  ;;  %1680 = vst [vmem:[%s2641_s22 + $0x58] sm:$0xff] %v1679_v48  ;;  %v1683_v26 = vld [vmem:[%s2645_s13 + $0x68] sm:$0xff]  ;;  %v1685_v46 = vld [vmem:[%s2645_s13 + $0x70] sm:$0xff] }
 0x31d   : >> { %1682 = vst [vmem:[%s2641_s22 + $0x60] sm:$0xff] %v1681_v41  ;;  %1684 = vst [vmem:[%s2641_s22 + $0x68] sm:$0xff] %v1683_v26  ;;  %v1687_v0 = vld [vmem:[%s2645_s13 + $0x78] sm:$0xff]  ;;  %v1689_v30 = vld [vmem:[%s2645_s13 + $0x80] sm:$0xff] }
 0x31e   : >> { %1686 = vst [vmem:[%s2641_s22 + $0x70] sm:$0xff] %v1685_v46  ;;  %v1691_v21 = vld [vmem:[%s2645_s13 + $0x88] sm:$0xff]  ;;  %1688 = vst [vmem:[%s2641_s22 + $0x78] sm:$0xff] %v1687_v0  ;;  %s1698_s13 = scalar_lea.vmem %s3355_s9, %s1696_s28 [#allocation7]  }
 0x31f   : >> { %1690 = vst [vmem:[%s2641_s22 + $0x80] sm:$0xff] %v1689_v30  ;;  %1692 = vst [vmem:[%s2641_s22 + $0x88] sm:$0xff] %v1691_v21  ;;  %s1699_s22 = scalar_lea.vmem %s3417_s30, %s1696_s28  }
 0x320 PF: > { %2481 = sdivrem.u32 %s3542_s15, 18 }
 0x321   : > { %s1943_s25 = smul.u32 144, %s3423_s29 }
 0x323   : > { %s1704_s6 = scalar_lea.vmem %s3355_s9, %s1943_s25 [#allocation7]   ;;  %s1706_s8 = scalar_lea.vmem %s3417_s30, %s1943_s25  }
 0x329   : > { %s2482_s24 = spop.drf %2481 }
 0x32a   : > { %p1945_p8 = scmp.le.s32.totalorder %s2482_s24, 0 }
 0x32b   : > { %s2655_s11 = smov (!%p1945_p8), %s1706_s8   ;;  %s2659_s12 = smov (!%p1945_p8), %s1704_s6  }
 0x32c   : > { %1806 = sbr.rel (%p1945_p8) target bundleno = 829 (0x33d), region = 153  ;;  %s2663_s16 = smov (!%p1945_p8), 0  }
 0x32d   : > { %s2667_s27 = smov (!%p1945_p8), 0  }
 0x333 LB: >> { %v1716_v32 = vld [vmem:[%s2661_s12] sm:$0xff]  ;;  %s1718_s17 = sadd.s32 1, %s2665_s16  ;;  %s1710_s27 = sadd.s32 1, %s2669_s27   ;;  %s2669_s27 = sphi %s2667_s27, %s1710_s27   ;;  %s2665_s16 = sphi %s2663_s16, %s2664_s16   ;;  %s2661_s12 = sphi %s2659_s12, %s1723_s12   ;;  %s2657_s11 = sphi %s2655_s11, %s1724_s11  }
 0x334   : >> { %1717 = vst [vmem:[%s2657_s11] sm:$0xff] %v1716_v32  ;;  %p1719_p5 = scmp.ge.s32.totalorder %s1718_s17, %s2482_s24  ;;  %p1709_p4 = scmp.ge.s32.totalorder %s1710_s27, %s2482_s24 }
 0x336   : >> { %s3546_s17 = smov (%p1719_p5, %s1718_s17), 0  ;;  %1712 = sbr.rel (!%p1709_p4) target bundleno = 819 (0x333), region = 159 }
 0x337   : >> { %s1946_s9 = sshll.u32 %s3546_s17, 3  ;;  %s2664_s16 = smov %s3546_s17  }
 0x338   : >> { %s1723_s12 = scalar_lea.vmem %s1704_s6, %s1946_s9 [#allocation7]   ;;  %s1724_s11 = scalar_lea.vmem %s1706_s8, %s1946_s9  }
 0x33d PF: > { %p16_p11 = scmp.ge.s32.totalorder %s2730_s23, 5   ;;  %s3535_s18 = smov %s2629_s19 }
 0x33e   : > { %s3536_s19 = smov %s2633_s20  ;;  %s3537_s20 = smov %s2740_s26 }
 0x33f   : > { %s3538_s21 = smov %s2730_s23  ;;  %18 = sbr.rel (!%p16_p11) target bundleno = 4 (0x4), region = 170 }
 0x346   :  { %1740 = vsyncpa [#allocation3], 1 }
 0x347   :  { %1742 = vsyncpa [#allocation3 + $0x1], 1 }
 0x348   :  { %1743 = vsyncpa [#allocation5], 1 }

</bundles_post_ra>
